<compile_context>
chip_gen: v7x
topology: tpu7x:2x2x1
jax: 0.10.0
libtpu: 0.0.40
codegen_flags: <defaults>
</compile_context>

<pallas_src>
import functools

import numpy as np

import jax
import jax.numpy as jnp
from jax.experimental import pallas as pl
from jax.experimental.pallas import tpu as pltpu

_LANES = 128  # every activation / per-kernel-row output group is 128 lanes wide


# ---------------------------------------------------------------------------
# Fused Pallas kernel: the entire Discriminator forward in one pallas_call.
# ---------------------------------------------------------------------------
def _disc_kernel(a1_ref,
                 sel1_ref, u1_ref,
                 sel2_ref, u2_ref, p2_ref, g2_ref, b2_ref,
                 sel3_ref, u3_ref, p3_ref, g3_ref, b3_ref,
                 sel4_ref, u4_ref,
                 out_ref):
    def conv(a, selcat_ref, ucat_ref):
        # Two MXU matmuls per conv; kernel-row accumulation stays in the MXU.
        b = jnp.dot(a, ucat_ref[...], preferred_element_type=jnp.float32)
        bstack = jnp.concatenate(
            [b[:, i * _LANES:(i + 1) * _LANES] for i in range(4)], axis=0)
        return jnp.dot(selcat_ref[...], bstack,
                       preferred_element_type=jnp.float32)

    def leaky(v):
        return jnp.maximum(v, 0.2 * v)

    def bn_leaky(o, p_ref, g_ref, b_ref):
        # Training-mode BN over (N, H, W) per channel, in the (N*H, W*C) layout.
        # One matmul against the block-diagonal averaging matrix P handles both
        # the channel reduction and the re-broadcast across the W lane groups.
        s = jnp.concatenate([jnp.sum(o, axis=0, keepdims=True),
                             jnp.sum(o * o, axis=0, keepdims=True)], axis=1)
        stats = jnp.dot(s, p_ref[...], preferred_element_type=jnp.float32)
        mean = stats[:, :_LANES]
        var = stats[:, _LANES:] - mean * mean
        y = (o - mean) * jax.lax.rsqrt(var + 1e-5) * g_ref[...] + b_ref[...]
        return leaky(y)

    a = a1_ref[...]                                                # (N*32, 128)
    a = leaky(conv(a, sel1_ref, u1_ref))                           # conv1 + LReLU
    a = bn_leaky(conv(a, sel2_ref, u2_ref), p2_ref, g2_ref, b2_ref)  # conv2+BN+LReLU
    a = bn_leaky(conv(a, sel3_ref, u3_ref), p3_ref, g3_ref, b3_ref)  # conv3+BN+LReLU
    y = conv(a, sel4_ref, u4_ref)                                  # conv4 -> (N, 128)
    out_ref[...] = 1.0 / (1.0 + jnp.exp(-y))                       # sigmoid


_ARG_KEYS = ("sel1", "u1",
             "sel2", "u2", "p2", "g2", "b2",
             "sel3", "u3", "p3", "g3", "b3",
             "sel4", "u4")


def _prep_input(x_nchw, cin_pad):
    # NCHW -> NHWC -> (N*H, W*Cpad); zero-pad input channels so conv1's
    # contraction width W*Cin is exactly 128 lanes.
    n, c, h, w = x_nchw.shape
    x = jnp.transpose(x_nchw, (0, 2, 3, 1)).astype(jnp.float32)
    if cin_pad > c:
        x = jnp.pad(x, ((0, 0), (0, 0), (0, 0), (0, cin_pad - c)))
    return x.reshape(n * h, w * cin_pad)


@functools.partial(jax.jit, static_argnames=("cin_pad",))
def discriminator_forward(x_nchw, tables, *, cin_pad):
    n = x_nchw.shape[0]
    a1 = _prep_input(x_nchw, cin_pad)
    args = [a1] + [tables[k] for k in _ARG_KEYS]
    vmem_spec = pl.BlockSpec(memory_space=pltpu.MemorySpace.VMEM)
    out = pl.pallas_call(
        _disc_kernel,
        out_shape=jax.ShapeDtypeStruct((n, _LANES), jnp.float32),
        in_specs=[vmem_spec] * len(args),
        out_specs=vmem_spec,
    )(*args)
    return out[:, 0]                       # matches .view(-1, 1).squeeze(1)


# ---------------------------------------------------------------------------
# Host-side (one-time) table construction — pure layout/weight plumbing.
# ---------------------------------------------------------------------------
def _build_selcat(n, h_in, h_out, stride, pad):
    # SelCat[(b, oh), i*(n*h_in) + (b, h)] = 1 iff h == stride*oh + i - pad.
    # Rows falling in the zero-padding region stay all-zero.
    m_in = n * h_in
    sel = np.zeros((n * h_out, 4 * m_in), np.float32)
    for i in range(4):
        for b in range(n):
            for oh in range(h_out):
                h = stride * oh + i - pad
                if 0 <= h < h_in:
                    sel[b * h_out + oh, i * m_in + b * h_in + h] = 1.0
    return jnp.asarray(sel)


def _build_ucat(w_oihw, w_in, w_out, stride, pad, cin_pad):
    # UCat[(w, c), i*128 + (ow, co)] = W[co, c, i, j] with j = w - stride*ow + pad,
    # zero when the tap falls outside the window, on a padded input channel, or
    # in the lane padding past w_out*cout (conv4).
    cout, cin, kh, kw = w_oihw.shape
    assert w_out * cout <= _LANES
    wp = np.zeros((cout, cin_pad, kh, kw), np.float32)
    wp[:, :cin] = np.asarray(w_oihw)
    u = np.zeros((w_in * cin_pad, 4 * _LANES), np.float32)
    for i in range(kh):
        for ow in range(w_out):
            for j in range(kw):
                w = stride * ow + j - pad
                if 0 <= w < w_in:
                    u[w * cin_pad:(w + 1) * cin_pad,
                      i * _LANES + ow * cout:i * _LANES + (ow + 1) * cout] = \
                        wp[:, :, i, j].T
    return jnp.asarray(u)


def build_discriminator_tables(params, batch, spatial, num_channels, hidden_dim):
    cin_pad = ((num_channels + 3) // 4) * 4
    cfgs = [
        ("1", params["w1"], spatial,      cin_pad,        2, 1),
        ("2", params["w2"], spatial // 2, hidden_dim,     2, 1),
        ("3", params["w3"], spatial // 4, hidden_dim * 2, 2, 1),
        ("4", params["w4"], spatial // 8, hidden_dim * 4, 1, 0),
    ]
    tables = {}
    for name, w, h_in, cin_p, stride, pad in cfgs:
        h_out = (h_in + 2 * pad - 4) // stride + 1
        tables[f"sel{name}"] = _build_selcat(batch, h_in, h_out, stride, pad)
        tables[f"u{name}"] = _build_ucat(w, h_in, h_out, stride, pad, cin_p)
    # BatchNorm epilogue constants (layers 2 and 3): block-diagonal channel
    # averaging matrix (handles mean and E[x^2] in one matmul) and gamma/beta
    # pre-tiled to the (1, Wo*Cout) activation layout.
    for name, wo, cout in (("2", spatial // 4, hidden_dim * 2),
                           ("3", spatial // 8, hidden_dim * 4)):
        count = float(batch * wo * wo)                  # N*Ho*Wo (square maps)
        pavg = np.tile(np.eye(cout, dtype=np.float32), (wo, wo)) / count
        pblk = np.zeros((2 * _LANES, 2 * _LANES), np.float32)
        pblk[:_LANES, :_LANES] = pavg
        pblk[_LANES:, _LANES:] = pavg
        tables[f"p{name}"] = jnp.asarray(pblk)
        tables[f"g{name}"] = jnp.tile(params[f"g{name}"], (wo,)).reshape(1, wo * cout)
        tables[f"b{name}"] = jnp.tile(params[f"b{name}"], (wo,)).reshape(1, wo * cout)
    return tables, cin_pad


# ---------------------------------------------------------------------------
# Pure-JAX reference (lax.conv) for correctness checking.
# ---------------------------------------------------------------------------
def reference_forward(x_nchw, params):
    def conv(x, w, stride, pad):
        return jax.lax.conv_general_dilated(
            x, w, window_strides=(stride, stride),
            padding=[(pad, pad), (pad, pad)],
            dimension_numbers=("NCHW", "OIHW", "NCHW"))

    def leaky(v):
        return jnp.where(v > 0, v, 0.2 * v)

    def bn(v, g, b):
        mean = jnp.mean(v, axis=(0, 2, 3), keepdims=True)
        var = jnp.mean((v - mean) ** 2, axis=(0, 2, 3), keepdims=True)
        return (v - mean) * jax.lax.rsqrt(var + 1e-5) * g.reshape(1, -1, 1, 1) \
               + b.reshape(1, -1, 1, 1)

    x = x_nchw.astype(jnp.float32)
    y = leaky(conv(x, params["w1"], 2, 1))
    y = leaky(bn(conv(y, params["w2"], 2, 1), params["g2"], params["b2"]))
    y = leaky(bn(conv(y, params["w3"], 2, 1), params["g3"], params["b3"]))
    y = jax.nn.sigmoid(conv(y, params["w4"], 1, 0))
    return y.reshape(-1)


def init_params(key, num_channels, hidden_dim):
    k1, k2, k3, k4 = jax.random.split(key, 4)
    return {
        "w1": 0.02 * jax.random.normal(k1, (hidden_dim, num_channels, 4, 4), jnp.float32),
        "w2": 0.02 * jax.random.normal(k2, (hidden_dim * 2, hidden_dim, 4, 4), jnp.float32),
        "w3": 0.02 * jax.random.normal(k3, (hidden_dim * 4, hidden_dim * 2, 4, 4), jnp.float32),
        "w4": 0.02 * jax.random.normal(k4, (1, hidden_dim * 4, 4, 4), jnp.float32),
        "g2": jnp.ones((hidden_dim * 2,), jnp.float32),
        "b2": jnp.zeros((hidden_dim * 2,), jnp.float32),
        "g3": jnp.ones((hidden_dim * 4,), jnp.float32),
        "b3": jnp.zeros((hidden_dim * 4,), jnp.float32),
    }


if __name__ == "__main__":
    num_channels, hidden_dim = 3, 8
    batch, spatial = 2, 32          # 32 -> 16 -> 8 -> 4 -> 1x1; output shape (batch,)

    key = jax.random.PRNGKey(0)
    kx, kp = jax.random.split(key)
    x = jax.random.normal(kx, (batch, num_channels, spatial, spatial), jnp.float32)
    params = init_params(kp, num_channels, hidden_dim)
    tables, cin_pad = build_discriminator_tables(
        params, batch, spatial, num_channels, hidden_dim)

    out = jax.block_until_ready(discriminator_forward(x, tables, cin_pad=cin_pad))
    ref = jax.block_until_ready(reference_forward(x, params))

    assert out.shape == (batch,), out.shape
    assert jnp.allclose(out, ref, atol=5e-4, rtol=5e-4), (out, ref)
    print("KERNEL_OK")
</pallas_src>

<mosaic_0001>
module attributes {stable_mosaic.version = 11 : i64} {
  func.func @_disc_kernel(%arg0: memref<64x128xf32, #tpu.memory_space<vmem>>, %arg1: memref<32x256xf32, #tpu.memory_space<vmem>>, %arg2: memref<128x512xf32, #tpu.memory_space<vmem>>, %arg3: memref<16x128xf32, #tpu.memory_space<vmem>>, %arg4: memref<128x512xf32, #tpu.memory_space<vmem>>, %arg5: memref<256x256xf32, #tpu.memory_space<vmem>>, %arg6: memref<1x128xf32, #tpu.memory_space<vmem>>, %arg7: memref<1x128xf32, #tpu.memory_space<vmem>>, %arg8: memref<8x64xf32, #tpu.memory_space<vmem>>, %arg9: memref<128x512xf32, #tpu.memory_space<vmem>>, %arg10: memref<256x256xf32, #tpu.memory_space<vmem>>, %arg11: memref<1x128xf32, #tpu.memory_space<vmem>>, %arg12: memref<1x128xf32, #tpu.memory_space<vmem>>, %arg13: memref<2x32xf32, #tpu.memory_space<vmem>>, %arg14: memref<128x512xf32, #tpu.memory_space<vmem>>, %arg15: memref<2x128xf32, #tpu.memory_space<vmem>>) attributes {dimension_semantics = [], scalar_prefetch = 0 : i64, scratch_operands = 0 : i64, tpu.core_type = #tpu.core_type<tc>} {
    %c0 = arith.constant 0 : index
    %c0_0 = arith.constant 0 : index
    %0 = vector.load %arg0[%c0, %c0_0] : memref<64x128xf32, #tpu.memory_space<vmem>>, vector<64x128xf32>
    %c0_1 = arith.constant 0 : index
    %c0_2 = arith.constant 0 : index
    %1 = vector.load %arg2[%c0_1, %c0_2] : memref<128x512xf32, #tpu.memory_space<vmem>>, vector<128x512xf32>
    %cst = arith.constant dense<0.000000e+00> : vector<64x512xf32>
    %2 = tpu.matmul %0, %1, %cst {dimension_numbers = #tpu.dot_dimension_numbers<[1], [0], [0], [1], [0, 0, 1, 1], [], []>} : vector<64x128xf32>, vector<128x512xf32>, vector<64x512xf32> -> vector<64x512xf32>
    %3 = vector.extract_strided_slice %2 {offsets = [0, 0], sizes = [64, 128], strides = [1, 1]} : vector<64x512xf32> to vector<64x128xf32>
    %4 = vector.extract_strided_slice %2 {offsets = [0, 128], sizes = [64, 128], strides = [1, 1]} : vector<64x512xf32> to vector<64x128xf32>
    %5 = vector.extract_strided_slice %2 {offsets = [0, 256], sizes = [64, 128], strides = [1, 1]} : vector<64x512xf32> to vector<64x128xf32>
    %6 = vector.extract_strided_slice %2 {offsets = [0, 384], sizes = [64, 128], strides = [1, 1]} : vector<64x512xf32> to vector<64x128xf32>
    %7 = tpu.concatenate %3, %4, %5, %6 in 0 : vector<64x128xf32>, vector<64x128xf32>, vector<64x128xf32>, vector<64x128xf32> -> vector<256x128xf32>
    %c0_3 = arith.constant 0 : index
    %c0_4 = arith.constant 0 : index
    %8 = vector.load %arg1[%c0_3, %c0_4] : memref<32x256xf32, #tpu.memory_space<vmem>>, vector<32x256xf32>
    %cst_5 = arith.constant dense<0.000000e+00> : vector<32x128xf32>
    %9 = tpu.matmul %8, %7, %cst_5 {dimension_numbers = #tpu.dot_dimension_numbers<[1], [0], [0], [1], [0, 0, 1, 1], [], []>} : vector<32x256xf32>, vector<256x128xf32>, vector<32x128xf32> -> vector<32x128xf32>
    %cst_6 = arith.constant 2.000000e-01 : f32
    %10 = vector.broadcast %cst_6 : f32 to vector<32x128xf32>
    %11 = arith.mulf %10, %9 : vector<32x128xf32>
    %12 = arith.maximumf %9, %11 : vector<32x128xf32>
    %c0_7 = arith.constant 0 : index
    %c0_8 = arith.constant 0 : index
    %13 = vector.load %arg4[%c0_7, %c0_8] : memref<128x512xf32, #tpu.memory_space<vmem>>, vector<128x512xf32>
    %cst_9 = arith.constant dense<0.000000e+00> : vector<32x512xf32>
    %14 = tpu.matmul %12, %13, %cst_9 {dimension_numbers = #tpu.dot_dimension_numbers<[1], [0], [0], [1], [0, 0, 1, 1], [], []>} : vector<32x128xf32>, vector<128x512xf32>, vector<32x512xf32> -> vector<32x512xf32>
    %15 = vector.extract_strided_slice %14 {offsets = [0, 0], sizes = [32, 128], strides = [1, 1]} : vector<32x512xf32> to vector<32x128xf32>
    %16 = vector.extract_strided_slice %14 {offsets = [0, 128], sizes = [32, 128], strides = [1, 1]} : vector<32x512xf32> to vector<32x128xf32>
    %17 = vector.extract_strided_slice %14 {offsets = [0, 256], sizes = [32, 128], strides = [1, 1]} : vector<32x512xf32> to vector<32x128xf32>
    %18 = vector.extract_strided_slice %14 {offsets = [0, 384], sizes = [32, 128], strides = [1, 1]} : vector<32x512xf32> to vector<32x128xf32>
    %19 = tpu.concatenate %15, %16, %17, %18 in 0 : vector<32x128xf32>, vector<32x128xf32>, vector<32x128xf32>, vector<32x128xf32> -> vector<128x128xf32>
    %c0_10 = arith.constant 0 : index
    %c0_11 = arith.constant 0 : index
    %20 = vector.load %arg3[%c0_10, %c0_11] : memref<16x128xf32, #tpu.memory_space<vmem>>, vector<16x128xf32>
    %cst_12 = arith.constant dense<0.000000e+00> : vector<16x128xf32>
    %21 = tpu.matmul %20, %19, %cst_12 {dimension_numbers = #tpu.dot_dimension_numbers<[1], [0], [0], [1], [0, 0, 1, 1], [], []>} : vector<16x128xf32>, vector<128x128xf32>, vector<16x128xf32> -> vector<16x128xf32>
    %cst_13 = arith.constant dense<0.000000e+00> : vector<128xf32>
    %22 = vector.multi_reduction <add>, %21, %cst_13 [0] : vector<16x128xf32> to vector<128xf32>
    %23 = vector.shape_cast %22 : vector<128xf32> to vector<1x128xf32>
    %24 = arith.mulf %21, %21 : vector<16x128xf32>
    %cst_14 = arith.constant dense<0.000000e+00> : vector<128xf32>
    %25 = vector.multi_reduction <add>, %24, %cst_14 [0] : vector<16x128xf32> to vector<128xf32>
    %26 = vector.shape_cast %25 : vector<128xf32> to vector<1x128xf32>
    %27 = tpu.concatenate %23, %26 in 1 : vector<1x128xf32>, vector<1x128xf32> -> vector<1x256xf32>
    %c0_15 = arith.constant 0 : index
    %c0_16 = arith.constant 0 : index
    %28 = vector.load %arg5[%c0_15, %c0_16] : memref<256x256xf32, #tpu.memory_space<vmem>>, vector<256x256xf32>
    %cst_17 = arith.constant dense<0.000000e+00> : vector<1x256xf32>
    %29 = tpu.matmul %27, %28, %cst_17 {dimension_numbers = #tpu.dot_dimension_numbers<[1], [0], [0], [1], [0, 0, 1, 1], [], []>} : vector<1x256xf32>, vector<256x256xf32>, vector<1x256xf32> -> vector<1x256xf32>
    %30 = vector.extract_strided_slice %29 {offsets = [0, 0], sizes = [1, 128], strides = [1, 1]} : vector<1x256xf32> to vector<1x128xf32>
    %31 = vector.extract_strided_slice %29 {offsets = [0, 128], sizes = [1, 128], strides = [1, 1]} : vector<1x256xf32> to vector<1x128xf32>
    %32 = arith.mulf %30, %30 : vector<1x128xf32>
    %33 = arith.subf %31, %32 : vector<1x128xf32>
    %34 = vector.broadcast %30 : vector<1x128xf32> to vector<16x128xf32>
    %35 = arith.subf %21, %34 : vector<16x128xf32>
    %cst_18 = arith.constant 9.99999974E-6 : f32
    %36 = vector.broadcast %cst_18 : f32 to vector<1x128xf32>
    %37 = arith.addf %33, %36 : vector<1x128xf32>
    %38 = math.rsqrt %37 : vector<1x128xf32>
    %39 = vector.broadcast %38 : vector<1x128xf32> to vector<16x128xf32>
    %40 = arith.mulf %35, %39 : vector<16x128xf32>
    %c0_19 = arith.constant 0 : index
    %c0_20 = arith.constant 0 : index
    %41 = vector.load %arg6[%c0_19, %c0_20] : memref<1x128xf32, #tpu.memory_space<vmem>>, vector<1x128xf32>
    %42 = vector.broadcast %41 : vector<1x128xf32> to vector<16x128xf32>
    %43 = arith.mulf %40, %42 : vector<16x128xf32>
    %c0_21 = arith.constant 0 : index
    %c0_22 = arith.constant 0 : index
    %44 = vector.load %arg7[%c0_21, %c0_22] : memref<1x128xf32, #tpu.memory_space<vmem>>, vector<1x128xf32>
    %45 = vector.broadcast %44 : vector<1x128xf32> to vector<16x128xf32>
    %46 = arith.addf %43, %45 : vector<16x128xf32>
    %cst_23 = arith.constant 2.000000e-01 : f32
    %47 = vector.broadcast %cst_23 : f32 to vector<16x128xf32>
    %48 = arith.mulf %47, %46 : vector<16x128xf32>
    %49 = arith.maximumf %46, %48 : vector<16x128xf32>
    %c0_24 = arith.constant 0 : index
    %c0_25 = arith.constant 0 : index
    %50 = vector.load %arg9[%c0_24, %c0_25] : memref<128x512xf32, #tpu.memory_space<vmem>>, vector<128x512xf32>
    %cst_26 = arith.constant dense<0.000000e+00> : vector<16x512xf32>
    %51 = tpu.matmul %49, %50, %cst_26 {dimension_numbers = #tpu.dot_dimension_numbers<[1], [0], [0], [1], [0, 0, 1, 1], [], []>} : vector<16x128xf32>, vector<128x512xf32>, vector<16x512xf32> -> vector<16x512xf32>
    %52 = vector.extract_strided_slice %51 {offsets = [0, 0], sizes = [16, 128], strides = [1, 1]} : vector<16x512xf32> to vector<16x128xf32>
    %53 = vector.extract_strided_slice %51 {offsets = [0, 128], sizes = [16, 128], strides = [1, 1]} : vector<16x512xf32> to vector<16x128xf32>
    %54 = vector.extract_strided_slice %51 {offsets = [0, 256], sizes = [16, 128], strides = [1, 1]} : vector<16x512xf32> to vector<16x128xf32>
    %55 = vector.extract_strided_slice %51 {offsets = [0, 384], sizes = [16, 128], strides = [1, 1]} : vector<16x512xf32> to vector<16x128xf32>
    %56 = tpu.concatenate %52, %53, %54, %55 in 0 : vector<16x128xf32>, vector<16x128xf32>, vector<16x128xf32>, vector<16x128xf32> -> vector<64x128xf32>
    %c0_27 = arith.constant 0 : index
    %c0_28 = arith.constant 0 : index
    %57 = vector.load %arg8[%c0_27, %c0_28] : memref<8x64xf32, #tpu.memory_space<vmem>>, vector<8x64xf32>
    %cst_29 = arith.constant dense<0.000000e+00> : vector<8x128xf32>
    %58 = tpu.matmul %57, %56, %cst_29 {dimension_numbers = #tpu.dot_dimension_numbers<[1], [0], [0], [1], [0, 0, 1, 1], [], []>} : vector<8x64xf32>, vector<64x128xf32>, vector<8x128xf32> -> vector<8x128xf32>
    %cst_30 = arith.constant dense<0.000000e+00> : vector<128xf32>
    %59 = vector.multi_reduction <add>, %58, %cst_30 [0] : vector<8x128xf32> to vector<128xf32>
    %60 = vector.shape_cast %59 : vector<128xf32> to vector<1x128xf32>
    %61 = arith.mulf %58, %58 : vector<8x128xf32>
    %cst_31 = arith.constant dense<0.000000e+00> : vector<128xf32>
    %62 = vector.multi_reduction <add>, %61, %cst_31 [0] : vector<8x128xf32> to vector<128xf32>
    %63 = vector.shape_cast %62 : vector<128xf32> to vector<1x128xf32>
    %64 = tpu.concatenate %60, %63 in 1 : vector<1x128xf32>, vector<1x128xf32> -> vector<1x256xf32>
    %c0_32 = arith.constant 0 : index
    %c0_33 = arith.constant 0 : index
    %65 = vector.load %arg10[%c0_32, %c0_33] : memref<256x256xf32, #tpu.memory_space<vmem>>, vector<256x256xf32>
    %cst_34 = arith.constant dense<0.000000e+00> : vector<1x256xf32>
    %66 = tpu.matmul %64, %65, %cst_34 {dimension_numbers = #tpu.dot_dimension_numbers<[1], [0], [0], [1], [0, 0, 1, 1], [], []>} : vector<1x256xf32>, vector<256x256xf32>, vector<1x256xf32> -> vector<1x256xf32>
    %67 = vector.extract_strided_slice %66 {offsets = [0, 0], sizes = [1, 128], strides = [1, 1]} : vector<1x256xf32> to vector<1x128xf32>
    %68 = vector.extract_strided_slice %66 {offsets = [0, 128], sizes = [1, 128], strides = [1, 1]} : vector<1x256xf32> to vector<1x128xf32>
    %69 = arith.mulf %67, %67 : vector<1x128xf32>
    %70 = arith.subf %68, %69 : vector<1x128xf32>
    %71 = vector.broadcast %67 : vector<1x128xf32> to vector<8x128xf32>
    %72 = arith.subf %58, %71 : vector<8x128xf32>
    %cst_35 = arith.constant 9.99999974E-6 : f32
    %73 = vector.broadcast %cst_35 : f32 to vector<1x128xf32>
    %74 = arith.addf %70, %73 : vector<1x128xf32>
    %75 = math.rsqrt %74 : vector<1x128xf32>
    %76 = vector.broadcast %75 : vector<1x128xf32> to vector<8x128xf32>
    %77 = arith.mulf %72, %76 : vector<8x128xf32>
    %c0_36 = arith.constant 0 : index
    %c0_37 = arith.constant 0 : index
    %78 = vector.load %arg11[%c0_36, %c0_37] : memref<1x128xf32, #tpu.memory_space<vmem>>, vector<1x128xf32>
    %79 = vector.broadcast %78 : vector<1x128xf32> to vector<8x128xf32>
    %80 = arith.mulf %77, %79 : vector<8x128xf32>
    %c0_38 = arith.constant 0 : index
    %c0_39 = arith.constant 0 : index
    %81 = vector.load %arg12[%c0_38, %c0_39] : memref<1x128xf32, #tpu.memory_space<vmem>>, vector<1x128xf32>
    %82 = vector.broadcast %81 : vector<1x128xf32> to vector<8x128xf32>
    %83 = arith.addf %80, %82 : vector<8x128xf32>
    %cst_40 = arith.constant 2.000000e-01 : f32
    %84 = vector.broadcast %cst_40 : f32 to vector<8x128xf32>
    %85 = arith.mulf %84, %83 : vector<8x128xf32>
    %86 = arith.maximumf %83, %85 : vector<8x128xf32>
    %c0_41 = arith.constant 0 : index
    %c0_42 = arith.constant 0 : index
    %87 = vector.load %arg14[%c0_41, %c0_42] : memref<128x512xf32, #tpu.memory_space<vmem>>, vector<128x512xf32>
    %cst_43 = arith.constant dense<0.000000e+00> : vector<8x512xf32>
    %88 = tpu.matmul %86, %87, %cst_43 {dimension_numbers = #tpu.dot_dimension_numbers<[1], [0], [0], [1], [0, 0, 1, 1], [], []>} : vector<8x128xf32>, vector<128x512xf32>, vector<8x512xf32> -> vector<8x512xf32>
    %89 = vector.extract_strided_slice %88 {offsets = [0, 0], sizes = [8, 128], strides = [1, 1]} : vector<8x512xf32> to vector<8x128xf32>
    %90 = vector.extract_strided_slice %88 {offsets = [0, 128], sizes = [8, 128], strides = [1, 1]} : vector<8x512xf32> to vector<8x128xf32>
    %91 = vector.extract_strided_slice %88 {offsets = [0, 256], sizes = [8, 128], strides = [1, 1]} : vector<8x512xf32> to vector<8x128xf32>
    %92 = vector.extract_strided_slice %88 {offsets = [0, 384], sizes = [8, 128], strides = [1, 1]} : vector<8x512xf32> to vector<8x128xf32>
    %93 = tpu.concatenate %89, %90, %91, %92 in 0 : vector<8x128xf32>, vector<8x128xf32>, vector<8x128xf32>, vector<8x128xf32> -> vector<32x128xf32>
    %c0_44 = arith.constant 0 : index
    %c0_45 = arith.constant 0 : index
    %94 = vector.load %arg13[%c0_44, %c0_45] : memref<2x32xf32, #tpu.memory_space<vmem>>, vector<2x32xf32>
    %cst_46 = arith.constant dense<0.000000e+00> : vector<2x128xf32>
    %95 = tpu.matmul %94, %93, %cst_46 {dimension_numbers = #tpu.dot_dimension_numbers<[1], [0], [0], [1], [0, 0, 1, 1], [], []>} : vector<2x32xf32>, vector<32x128xf32>, vector<2x128xf32> -> vector<2x128xf32>
    %cst_47 = arith.constant 0.000000e+00 : f32
    %96 = vector.broadcast %cst_47 : f32 to vector<2x128xf32>
    %97 = arith.subf %96, %95 : vector<2x128xf32>
    %98 = math.exp %97 : vector<2x128xf32>
    %cst_48 = arith.constant 1.000000e+00 : f32
    %99 = vector.broadcast %cst_48 : f32 to vector<2x128xf32>
    %100 = arith.addf %99, %98 : vector<2x128xf32>
    %cst_49 = arith.constant 1.000000e+00 : f32
    %101 = vector.broadcast %cst_49 : f32 to vector<2x128xf32>
    %102 = arith.divf %101, %100 : vector<2x128xf32>
    %c0_50 = arith.constant 0 : index
    %c0_51 = arith.constant 0 : index
    %103 = vector.load %arg15[%c0_50, %c0_51] : memref<2x128xf32, #tpu.memory_space<vmem>>, vector<2x128xf32>
    tpu.vector_store %arg15[%c0_50, %c0_51], %102 {strides = array<i32>} : memref<2x128xf32, #tpu.memory_space<vmem>>, vector<2x128xf32>,
    return
  }
}

</mosaic_0001>

<bundles_post_ra>
// kernel: discriminator_forward.1
= control target key start
LH: loop header
LB: loop body
LE: loop exit
PB: predicated region body
PF: predicated region fallthrough
CT: control target
= control target key end

     0   :  { %20 = vsyncpa [#allocation3], 0  ;;  %s3182_s0 = inlined_call_operand.vmem [shape: f32[64,128], index: 0, kind: input, shape index: {}]   ;;  %s3183_s1 = inlined_call_operand.vmem [shape: f32[32,256], index: 1, kind: input, shape index: {}]   ;;  %s3184_s2 = inlined_call_operand.vmem [shape: f32[128,512], index: 2, kind: input, shape index: {}]   ;;  %s3185_s3 = inlined_call_operand.vmem [shape: f32[16,128], index: 3, kind: input, shape index: {}]   ;;  %s3186_s4 = inlined_call_operand.vmem [shape: f32[128,512], index: 4, kind: input, shape index: {}]   ;;  %s3187_s5 = inlined_call_operand.hbm [shape: f32[256,256], index: 5, kind: input, shape index: {}]   ;;  %s3188_s6 = inlined_call_operand.vmem [shape: f32[1,128], index: 6, kind: input, shape index: {}]   ;;  %s3189_s7 = inlined_call_operand.vmem [shape: f32[1,128], index: 7, kind: input, shape index: {}]   ;;  %s3190_s8 = inlined_call_operand.vmem [shape: f32[8,64], index: 8, kind: input, shape index: {}]   ;;  %s3191_s9 = inlined_call_operand.hbm [shape: f32[128,512], index: 9, kind: input, shape index: {}]   ;;  %s3192_s10 = inlined_call_operand.hbm [shape: f32[256,256], index: 10, kind: input, shape index: {}]   ;;  %s3193_s11 = inlined_call_operand.vmem [shape: f32[1,128], index: 11, kind: input, shape index: {}]   ;;  %s3194_s12 = inlined_call_operand.vmem [shape: f32[1,128], index: 12, kind: input, shape index: {}]   ;;  %s3195_s13 = inlined_call_operand.vmem [shape: f32[2,32], index: 13, kind: input, shape index: {}]   ;;  %s3196_s14 = inlined_call_operand.hbm [shape: f32[128,512], index: 14, kind: input, shape index: {}]   ;;  %s3197_s15 = inlined_call_operand.vmem [shape: f32[2,128], index: 15, kind: output, shape index: {}]  }
   0x1   :  { %21 = vsyncpa [#allocation5], 0 }
   0x2   :  { %22 = vsyncpa [#allocation8], 0  ;;  %s2506_s18 = smov [#allocation4]   ;;  %s2412_s22 = scalar_lea.hbm %s3191_s9, 8192 }
   0x3   :  { %s56_s19 = sshll.u32 %s2506_s18, 4  ;;  %p2413_p0 = scmp.ne.s32.totalorder %s3191_s9, %s2412_s22  ;;  %s57_s19 = int_to_ptr.vmem [resolvable:$true] %s56_s19 }
   0x4   :  { %p2416_p1 = scmp.lt.u32.totalorder %s2412_s22, %s3191_s9 }
   0x6   :  { %p2418_p2 = pnand %p2416_p1, %p2413_p0 }
   0x8   :  { %2421 = shalt.err (!%p2418_p2)
}
   0x9   :  { %s2422_s27 = scalar_lea.vmem %s57_s19, 8192  ;;  %p2427_p4 = scmp.lt.s32.totalorder %s57_s19, %s57_s19 }
   0xa   :  { %p2423_p3 = scmp.ne.s32.totalorder %s57_s19, %s2422_s27  ;;  %p2428_p5 = scmp.lt.s32.totalorder %s2422_s27, %s2422_s27 }
   0xc   :  { %p2429_p6 = por %p2428_p5, %p2427_p4 }
   0xe   :  { %p2430_p7 = pnand %p2429_p6, %p2423_p3 }
  0x10   :  { %2433 = shalt.err (!%p2430_p7)
}
  0x11   :  { %s3198_s28 = smov 512   ;;  %s3199_s29 = smov 32  }
  0x12   :  { %62 = dma.hbm_to_vmem [thread:$0]  %s3191_s9, 8192, %s57_s19, [#allocation5], %s3198_s28, %s3198_s28, %s3199_s29  }
  0x13   :  { %s2509_s17 = smov [#allocation2]   ;;  %s2434_s22 = scalar_lea.hbm %s3187_s5, 8192 }
  0x14   :  { %s38_s18 = sshll.u32 %s2509_s17, 4  ;;  %p2435_p8 = scmp.ne.s32.totalorder %s3187_s5, %s2434_s22  ;;  %s39_s18 = int_to_ptr.vmem [resolvable:$true] %s38_s18 }
  0x15   :  { %p2438_p9 = scmp.lt.u32.totalorder %s2434_s22, %s3187_s5 }
  0x17   :  { %p2440_p10 = pnand %p2438_p9, %p2435_p8 }
  0x19   :  { %2443 = shalt.err (!%p2440_p10)
}
  0x1a   :  { %s2444_s27 = scalar_lea.vmem %s39_s18, 8192  ;;  %p2449_p12 = scmp.lt.s32.totalorder %s39_s18, %s39_s18 }
  0x1b   :  { %p2445_p11 = scmp.ne.s32.totalorder %s39_s18, %s2444_s27  ;;  %p2450_p13 = scmp.lt.s32.totalorder %s2444_s27, %s2444_s27 }
  0x1d   :  { %p2451_p0 = por %p2450_p13, %p2449_p12 }
  0x1f   :  { %p2452_p1 = pnand %p2451_p0, %p2445_p11 }
  0x21   :  { %2455 = shalt.err (!%p2452_p1)
}
  0x22   :  { %s2510_s9 = smov 256   ;;  %s2511_s19 = smov 16  }
  0x23   :  { %44 = dma.hbm_to_vmem [thread:$0]  %s3187_s5, 8192, %s39_s18, [#allocation3], %s2510_s9, %s2510_s9, %s2511_s19  }
  0x24   :  { %s2512_s17 = smov [#allocation6]   ;;  %s2513_s21 = smov [#allocation7]  }
  0x25   :  { %s68_s20 = sshll.u32 %s2512_s17, 4  ;;  %s86_s23 = sshll.u32 %s2513_s21, 4  ;;  %s69_s20 = int_to_ptr.vmem [resolvable:$true] %s68_s20  ;;  %s2624_s23 = int_to_ptr.vmem [resolvable:$true] %s86_s23 }
  0x26   :  { %s2456_s25 = scalar_lea.hbm %s3192_s10, 8192 }
  0x27   :  { %p2457_p2 = scmp.ne.s32.totalorder %s3192_s10, %s2456_s25  ;;  %p2460_p3 = scmp.lt.u32.totalorder %s2456_s25, %s3192_s10 }
  0x29   :  { %p2462_p4 = pnand %p2460_p3, %p2457_p2 }
  0x2b   :  { %2465 = shalt.err (!%p2462_p4)
}
  0x2c   :  { %s2466_s5 = scalar_lea.vmem %s69_s20, 8192  ;;  %p2471_p6 = scmp.lt.s32.totalorder %s69_s20, %s69_s20 }
  0x2d   :  { %p2467_p5 = scmp.ne.s32.totalorder %s69_s20, %s2466_s5  ;;  %p2472_p7 = scmp.lt.s32.totalorder %s2466_s5, %s2466_s5 }
  0x2f   :  { %p2473_p8 = por %p2472_p7, %p2471_p6 }
  0x31   :  { %p2474_p9 = pnand %p2473_p8, %p2467_p5 }
  0x33   :  { %2477 = shalt.err (!%p2474_p9)
}
  0x34   :  { %74 = dma.hbm_to_vmem [thread:$0]  %s3192_s10, 8192, %s69_s20, [#allocation5], %s2510_s9, %s2510_s9, %s2511_s19  }
  0x35   :  { %s2478_s21 = scalar_lea.hbm %s3196_s14, 8192 }
  0x36   :  { %p2479_p10 = scmp.ne.s32.totalorder %s3196_s14, %s2478_s21  ;;  %p2482_p11 = scmp.lt.u32.totalorder %s2478_s21, %s3196_s14 }
  0x38   :  { %p2484_p12 = pnand %p2482_p11, %p2479_p10 }
  0x3a   :  { %2487 = shalt.err (!%p2484_p12)
}
  0x3b   :  { %s2488_s25 = scalar_lea.vmem %s2624_s23, 8192  ;;  %p2493_p0 = scmp.lt.s32.totalorder %s2624_s23, %s2624_s23 }
  0x3c   :  { %p2489_p13 = scmp.ne.s32.totalorder %s2624_s23, %s2488_s25  ;;  %p2494_p1 = scmp.lt.s32.totalorder %s2488_s25, %s2488_s25 }
  0x3e   :  { %p2495_p2 = por %p2494_p1, %p2493_p0 }
  0x40   :  { %p2496_p3 = pnand %p2495_p2, %p2489_p13 }
  0x42   :  { %2499 = shalt.err (!%p2496_p3)
}
  0x43   :  { %s3200_s10 = smov 32   ;;  %s3201_s9 = smov 512  }
  0x44   :  { %92 = dma.hbm_to_vmem [thread:$0]  %s3196_s14, 8192, %s2624_s23, [#allocation8], %s3201_s9, %s3201_s9, %s3200_s10  }
  0x45   :  { %2500 = dma.done.wait [#allocation3], 8192  }
  0x46   :  { %2501 = vsyncadd [#allocation3], 4294959104 }
  0x47   :  { %2502 = dma.done.wait [#allocation5], 16384  }
  0x48   :  { %2503 = vsyncadd [#allocation5], 4294950912 }
  0x49   :  { %2504 = dma.done.wait [#allocation8], 8192  }
  0x4a   :  { %2505 = vsyncadd [#allocation8], 4294959104  ;;  %v2514_v0 = vmov 0.0   ;;  %v114_v1 = vld [vmem:[%s3184_s2 + $0x8] sm:$0xff]  ;;  %v116_v3 = vld [vmem:[%s3184_s2 + $0x18] sm:$0xff]  ;;  %vm2516_vm0 = vmmov 0  }
  0x4b   :  { %241 = vmatprep.mubr.f32.mxu0 %v2514_v0  ;;  %354 = vmatprep.mubr.f32.mxu1 %v2514_v0  ;;  %v118_v2 = vld [vmem:[%s3184_s2 + $0x28] sm:$0xff]  ;;  %v120_v5 = vld [vmem:[%s3184_s2 + $0x38] sm:$0xff]  ;;  %v113_v6 = vld [vmem:[%s3184_s2] sm:$0xff]  ;;  %vm1231_vm1 = vcmask 523264   ;;  %vm1692_vm2 = vcmask 261120  }
  0x4c   :  { %v1927_v4 = vpack.c.bf16 %v118_v2, %v114_v1  ;;  %v117_v7 = vld [vmem:[%s3184_s2 + $0x20] sm:$0xff]  ;;  %v1959_v8 = vpack.c.bf16 %v120_v5, %v116_v3  ;;  %v115_v10 = vld [vmem:[%s3184_s2 + $0x10] sm:$0xff]  ;;  %v122_v12 = vld [vmem:[%s3184_s2 + $0x48] sm:$0xff] }
  0x4d   :  { %v1929_v9 = vpack.c.bf16 %v117_v7, %v113_v6  ;;  %v119_v11 = vld [vmem:[%s3184_s2 + $0x30] sm:$0xff]  ;;  %v126_v14 = vld [vmem:[%s3184_s2 + $0x68] sm:$0xff]  ;;  %v124_v15 = vld [vmem:[%s3184_s2 + $0x58] sm:$0xff] }
  0x4e   :  { %1928 = vmatprep.subr.bf16.mxu0 %v1927_v4  ;;  %v1961_v13 = vpack.c.bf16 %v119_v11, %v115_v10  ;;  %v128_v16 = vld [vmem:[%s3184_s2 + $0x78] sm:$0xff]  ;;  %1960 = vmatprep.subr.bf16.mxu1 %v1959_v8  ;;  %v1931_v17 = vpack.c.bf16 %v126_v14, %v122_v12  ;;  %v121_v19 = vld [vmem:[%s3184_s2 + $0x40] sm:$0xff]  ;;  %v123_v21 = vld [vmem:[%s3184_s2 + $0x50] sm:$0xff] }
  0x4f   :  { %1930 = vmatpush1.bf16.msra.mxu0 %v1929_v9  ;;  %v1963_v18 = vpack.c.bf16 %v128_v16, %v124_v15  ;;  %v125_v20 = vld [vmem:[%s3184_s2 + $0x60] sm:$0xff]  ;;  %v127_v23 = vld [vmem:[%s3184_s2 + $0x70] sm:$0xff]  ;;  %v130_v24 = vld [vmem:[%s3184_s2 + $0x88] sm:$0xff] }
  0x50   :  { %1962 = vmatpush1.bf16.msra.mxu1 %v1961_v13  ;;  %v1933_v22 = vpack.c.bf16 %v125_v20, %v121_v19  ;;  %v134_v25 = vld [vmem:[%s3184_s2 + $0xa8] sm:$0xff]  ;;  %1932 = vmatprep.subr.bf16.mxu0 %v1931_v17  ;;  %v1965_v26 = vpack.c.bf16 %v127_v23, %v123_v21  ;;  %v132_v28 = vld [vmem:[%s3184_s2 + $0x98] sm:$0xff]  ;;  %v129_v30 = vld [vmem:[%s3184_s2 + $0x80] sm:$0xff] }
  0x51   :  { %1964 = vmatprep.subr.bf16.mxu1 %v1963_v18  ;;  %v1935_v27 = vpack.c.bf16 %v134_v25, %v130_v24  ;;  %v136_v29 = vld [vmem:[%s3184_s2 + $0xb8] sm:$0xff]  ;;  %v133_v32 = vld [vmem:[%s3184_s2 + $0xa0] sm:$0xff]  ;;  %v131_v33 = vld [vmem:[%s3184_s2 + $0x90] sm:$0xff] }
  0x52   :  { %v1967_v31 = vpack.c.bf16 %v136_v29, %v132_v28  ;;  %v135_v34 = vld [vmem:[%s3184_s2 + $0xb0] sm:$0xff]  ;;  %v1937_v35 = vpack.c.bf16 %v133_v32, %v129_v30  ;;  %v138_v36 = vld [vmem:[%s3184_s2 + $0xc8] sm:$0xff]  ;;  %v140_v38 = vld [vmem:[%s3184_s2 + $0xd8] sm:$0xff] }
  0x53   :  { %1934 = vmatpush1.bf16.msra.mxu0 %v1933_v22  ;;  %v142_v37 = vld [vmem:[%s3184_s2 + $0xe8] sm:$0xff]  ;;  %v1969_v39 = vpack.c.bf16 %v135_v34, %v131_v33  ;;  %v144_v41 = vld [vmem:[%s3184_s2 + $0xf8] sm:$0xff]  ;;  %v137_v42 = vld [vmem:[%s3184_s2 + $0xc0] sm:$0xff] }
  0x54   :  { %1966 = vmatpush1.bf16.msra.mxu1 %v1965_v26  ;;  %1936 = vmatprep.subr.bf16.mxu0 %v1935_v27  ;;  %v1939_v40 = vpack.c.bf16 %v142_v37, %v138_v36  ;;  %v141_v43 = vld [vmem:[%s3184_s2 + $0xe0] sm:$0xff]  ;;  %v1971_v44 = vpack.c.bf16 %v144_v41, %v140_v38  ;;  %v139_v45 = vld [vmem:[%s3184_s2 + $0xd0] sm:$0xff]  ;;  %v146_v47 = vld [vmem:[%s3184_s2 + $0x108] sm:$0xff] }
  0x55   :  { %1968 = vmatprep.subr.bf16.mxu1 %v1967_v31  ;;  %v143_v46 = vld [vmem:[%s3184_s2 + $0xf0] sm:$0xff]  ;;  %v150_v48 = vld [vmem:[%s3184_s2 + $0x128] sm:$0xff]  ;;  %v148_v49 = vld [vmem:[%s3184_s2 + $0x118] sm:$0xff]  ;;  %v1941_v51 = vpack.c.bf16 %v141_v43, %v137_v42 }
  0x56   :  { %v152_v50 = vld [vmem:[%s3184_s2 + $0x138] sm:$0xff]  ;;  %v1973_v52 = vpack.c.bf16 %v143_v46, %v139_v45  ;;  %v1943_v53 = vpack.c.bf16 %v150_v48, %v146_v47  ;;  %v145_v54 = vld [vmem:[%s3184_s2 + $0x100] sm:$0xff]  ;;  %v147_v56 = vld [vmem:[%s3184_s2 + $0x110] sm:$0xff] }
  0x57   :  { %1938 = vmatpush1.bf16.msra.mxu0 %v1937_v35  ;;  %v149_v55 = vld [vmem:[%s3184_s2 + $0x120] sm:$0xff]  ;;  %v1975_v57 = vpack.c.bf16 %v152_v50, %v148_v49  ;;  %v151_v58 = vld [vmem:[%s3184_s2 + $0x130] sm:$0xff]  ;;  %v154_v59 = vld [vmem:[%s3184_s2 + $0x148] sm:$0xff] }
  0x58   :  { %1970 = vmatpush1.bf16.msra.mxu1 %v1969_v39  ;;  %1940 = vmatprep.subr.bf16.mxu0 %v1939_v40  ;;  %v158_v60 = vld [vmem:[%s3184_s2 + $0x168] sm:$0xff]  ;;  %v156_v61 = vld [vmem:[%s3184_s2 + $0x158] sm:$0xff]  ;;  %v1945_v63 = vpack.c.bf16 %v149_v55, %v145_v54  ;;  %v1977_v1 = vpack.c.bf16 %v151_v58, %v147_v56  ;;  %v153_v3 = vld [vmem:[%s3184_s2 + $0x140] sm:$0xff] }
  0x59   :  { %1972 = vmatprep.subr.bf16.mxu1 %v1971_v44  ;;  %v160_v62 = vld [vmem:[%s3184_s2 + $0x178] sm:$0xff]  ;;  %v1947_v2 = vpack.c.bf16 %v158_v60, %v154_v59  ;;  %v157_v4 = vld [vmem:[%s3184_s2 + $0x160] sm:$0xff]  ;;  %v155_v5 = vld [vmem:[%s3184_s2 + $0x150] sm:$0xff] }
  0x5a   :  { %v1979_v6 = vpack.c.bf16 %v160_v62, %v156_v61  ;;  %v159_v7 = vld [vmem:[%s3184_s2 + $0x170] sm:$0xff]  ;;  %v162_v8 = vld [vmem:[%s3184_s2 + $0x188] sm:$0xff]  ;;  %v164_v10 = vld [vmem:[%s3184_s2 + $0x198] sm:$0xff]  ;;  %v1949_v12 = vpack.c.bf16 %v157_v4, %v153_v3 }
  0x5b   :  { %1942 = vmatpush1.bf16.msra.mxu0 %v1941_v51  ;;  %v166_v9 = vld [vmem:[%s3184_s2 + $0x1a8] sm:$0xff]  ;;  %v168_v11 = vld [vmem:[%s3184_s2 + $0x1b8] sm:$0xff]  ;;  %v1981_v13 = vpack.c.bf16 %v159_v7, %v155_v5  ;;  %v161_v15 = vld [vmem:[%s3184_s2 + $0x180] sm:$0xff] }
  0x5c   :  { %1974 = vmatpush1.bf16.msra.mxu1 %v1973_v52  ;;  %1944 = vmatprep.subr.bf16.mxu0 %v1943_v53  ;;  %v1951_v14 = vpack.c.bf16 %v166_v9, %v162_v8  ;;  %v165_v16 = vld [vmem:[%s3184_s2 + $0x1a0] sm:$0xff]  ;;  %v163_v17 = vld [vmem:[%s3184_s2 + $0x190] sm:$0xff]  ;;  %v1983_v18 = vpack.c.bf16 %v168_v11, %v164_v10  ;;  %v170_v20 = vld [vmem:[%s3184_s2 + $0x1c8] sm:$0xff] }
  0x5d   :  { %1976 = vmatprep.subr.bf16.mxu1 %v1975_v57  ;;  %v167_v19 = vld [vmem:[%s3184_s2 + $0x1b0] sm:$0xff]  ;;  %v174_v21 = vld [vmem:[%s3184_s2 + $0x1e8] sm:$0xff]  ;;  %v172_v22 = vld [vmem:[%s3184_s2 + $0x1d8] sm:$0xff]  ;;  %v1953_v24 = vpack.c.bf16 %v165_v16, %v161_v15 }
  0x5e   :  { %v176_v23 = vld [vmem:[%s3184_s2 + $0x1f8] sm:$0xff]  ;;  %v1985_v25 = vpack.c.bf16 %v167_v19, %v163_v17  ;;  %v1955_v26 = vpack.c.bf16 %v174_v21, %v170_v20  ;;  %v169_v27 = vld [vmem:[%s3184_s2 + $0x1c0] sm:$0xff]  ;;  %v171_v30 = vld [vmem:[%s3184_s2 + $0x1d0] sm:$0xff] }
  0x5f   :  { %1946 = vmatpush1.bf16.msra.mxu0 %v1945_v63  ;;  %v173_v28 = vld [vmem:[%s3184_s2 + $0x1e0] sm:$0xff]  ;;  %v1987_v29 = vpack.c.bf16 %v176_v23, %v172_v22  ;;  %v175_v31 = vld [vmem:[%s3184_s2 + $0x1f0] sm:$0xff]  ;;  %v106_v35 = vld [vmem:[%s3182_s0 + $0x8] sm:$0xff] }
  0x60   :  { %1978 = vmatpush1.bf16.msra.mxu1 %v1977_v1  ;;  %1948 = vmatprep.subr.bf16.mxu0 %v1947_v2  ;;  %v1957_v32 = vpack.c.bf16 %v173_v28, %v169_v27  ;;  %v1989_v33 = vpack.c.bf16 %v175_v31, %v171_v30  ;;  %v105_v34 = vld [vmem:[%s3182_s0] sm:$0xff]  ;;  %v107_v36 = vld [vmem:[%s3182_s0 + $0x10] sm:$0xff]  ;;  %v108_v37 = vld [vmem:[%s3182_s0 + $0x18] sm:$0xff] }
  0x61   :  { %1980 = vmatprep.subr.bf16.mxu1 %v1979_v6  ;;  %v109_v38 = vld [vmem:[%s3182_s0 + $0x20] sm:$0xff]  ;;  %v110_v39 = vld [vmem:[%s3182_s0 + $0x28] sm:$0xff]  ;;  %v111_v40 = vld [vmem:[%s3182_s0 + $0x30] sm:$0xff] }
  0x62   :  { %v112_v41 = vld [vmem:[%s3182_s0 + $0x38] sm:$0xff]  ;;  %v404_v42 = vld [vmem:[%s3183_s1 + $0x8] sm:$0xff]  ;;  %v504_v46 = vld [vmem:[%s3186_s4] sm:$0xff] }
  0x63   :  { %1950 = vmatpush1.bf16.msra.mxu0 %v1949_v12  ;;  %v505_v43 = vld [vmem:[%s3186_s4 + $0x8] sm:$0xff]  ;;  %v508_v47 = vld [vmem:[%s3186_s4 + $0x20] sm:$0xff] }
  0x64   :  { %1982 = vmatpush1.bf16.msra.mxu1 %v1981_v13  ;;  %1952 = vmatprep.subr.bf16.mxu0 %v1951_v14  ;;  %v509_v44 = vld [vmem:[%s3186_s4 + $0x28] sm:$0xff]  ;;  %v2025_v48 = vpack.c.bf16 %v508_v47, %v504_v46  ;;  %v512_v52 = vld [vmem:[%s3186_s4 + $0x40] sm:$0xff] }
  0x65   :  { %1984 = vmatprep.subr.bf16.mxu1 %v1983_v18  ;;  %v2023_v45 = vpack.c.bf16 %v509_v44, %v505_v43  ;;  %v513_v49 = vld [vmem:[%s3186_s4 + $0x48] sm:$0xff]  ;;  %v516_v53 = vld [vmem:[%s3186_s4 + $0x60] sm:$0xff] }
  0x66   :  { %v517_v50 = vld [vmem:[%s3186_s4 + $0x68] sm:$0xff]  ;;  %v2029_v54 = vpack.c.bf16 %v516_v53, %v512_v52  ;;  %v520_v58 = vld [vmem:[%s3186_s4 + $0x80] sm:$0xff] }
  0x67   :  { %1954 = vmatpush1.bf16.msra.mxu0 %v1953_v24  ;;  %v2027_v51 = vpack.c.bf16 %v517_v50, %v513_v49  ;;  %v521_v55 = vld [vmem:[%s3186_s4 + $0x88] sm:$0xff]  ;;  %v524_v59 = vld [vmem:[%s3186_s4 + $0xa0] sm:$0xff] }
  0x68   :  { %1986 = vmatpush1.bf16.msra.mxu1 %v1985_v25  ;;  %1956 = vmatprep.subr.bf16.mxu0 %v1955_v26  ;;  %v525_v56 = vld [vmem:[%s3186_s4 + $0xa8] sm:$0xff]  ;;  %v2033_v60 = vpack.c.bf16 %v524_v59, %v520_v58  ;;  %v528_v1 = vld [vmem:[%s3186_s4 + $0xc0] sm:$0xff] }
  0x69   :  { %1988 = vmatprep.subr.bf16.mxu1 %v1987_v29  ;;  %v2031_v57 = vpack.c.bf16 %v525_v56, %v521_v55  ;;  %v529_v61 = vld [vmem:[%s3186_s4 + $0xc8] sm:$0xff]  ;;  %v532_v2 = vld [vmem:[%s3186_s4 + $0xe0] sm:$0xff] }
  0x6a   :  { %v533_v62 = vld [vmem:[%s3186_s4 + $0xe8] sm:$0xff]  ;;  %v2037_v5 = vpack.c.bf16 %v532_v2, %v528_v1  ;;  %v536_v7 = vld [vmem:[%s3186_s4 + $0x100] sm:$0xff]  ;;  %v507_v1 = vld [vmem:[%s3186_s4 + $0x18] sm:$0xff] }
  0x6b   :  { %1958 = vmatpush1.bf16.msra.mxu0 %v1957_v32  ;;  %v2035_v63 = vpack.c.bf16 %v533_v62, %v529_v61  ;;  %v537_v3 = vld [vmem:[%s3186_s4 + $0x108] sm:$0xff]  ;;  %v540_v8 = vld [vmem:[%s3186_s4 + $0x120] sm:$0xff]  ;;  %v511_v2 = vld [vmem:[%s3186_s4 + $0x38] sm:$0xff] }
  0x6c   :  { %1990 = vmatpush1.bf16.msra.mxu1 %v1989_v33  ;;  %v541_v4 = vld [vmem:[%s3186_s4 + $0x128] sm:$0xff]  ;;  %v2041_v11 = vpack.c.bf16 %v540_v8, %v536_v7  ;;  %v544_v13 = vld [vmem:[%s3186_s4 + $0x140] sm:$0xff]  ;;  %v519_v7 = vld [vmem:[%s3186_s4 + $0x78] sm:$0xff] }
  0x6d   :  { %2024 = vmatprep.subr.bf16.mxu1 %v2023_v45  ;;  %v2039_v6 = vpack.c.bf16 %v541_v4, %v537_v3  ;;  %v545_v9 = vld [vmem:[%s3186_s4 + $0x148] sm:$0xff]  ;;  %v548_v14 = vld [vmem:[%s3186_s4 + $0x160] sm:$0xff]  ;;  %v2055_v3 = vpack.c.bf16 %v511_v2, %v507_v1  ;;  %v506_v4 = vld [vmem:[%s3186_s4 + $0x10] sm:$0xff] }
  0x6e   :  { %242 = vmatmul.mubr.f32.vlgmr.msra.gmra.mrb[0].mxu0 %v105_v34  ;;  %v549_v10 = vld [vmem:[%s3186_s4 + $0x168] sm:$0xff]  ;;  %v2045_v15 = vpack.c.bf16 %v548_v14, %v544_v13  ;;  %v403_v8 = vld [vmem:[%s3183_s1] sm:$0xff]  ;;  %v518_v13 = vld [vmem:[%s3186_s4 + $0x70] sm:$0xff] }
  0x6f   :  { %355 = vmatmul.mubr.f32.vlgmr.msra.gmra.mrb[0].mxu1 %v105_v34  ;;  %247 = vmatprep.mubr.f32.mxu0 %v2514_v0  ;;  %v2043_v12 = vpack.c.bf16 %v549_v10, %v545_v9  ;;  %v406_v10 = vld [vmem:[%s3183_s1 + $0x18] sm:$0xff]  ;;  %v562_v2 = vld [vmem:[%s3186_s4 + $0x1d0] sm:$0xff] }
  0x70   :  { %360 = vmatprep.mubr.f32.mxu1 %v2514_v0  ;;  %2026 = vmatpush1.bf16.msra.mxu1 %v2025_v48  ;;  %v523_v14 = vld [vmem:[%s3186_s4 + $0x98] sm:$0xff] }
  0x71   :  { %2028 = vmatprep.subr.bf16.mxu1 %v2027_v51 }
  0x72   :  { %248 = vmatmul.mubr.f32.gmra.mrb[2].mxu0 %v106_v35 }
  0x73   :  { %361 = vmatmul.mubr.f32.gmra.mrb[2].mxu1 %v106_v35  ;;  %253 = vmatprep.mubr.f32.mxu0 %v2514_v0 }
  0x74   :  { %366 = vmatprep.mubr.f32.mxu1 %v2514_v0  ;;  %2030 = vmatpush1.bf16.msra.mxu1 %v2029_v54 }
  0x75   :  { %2032 = vmatprep.subr.bf16.mxu1 %v2031_v57 }
  0x76   :  { %254 = vmatmul.mubr.f32.gmra.mrb[4].mxu0 %v107_v36 }
  0x77   :  { %367 = vmatmul.mubr.f32.gmra.mrb[4].mxu1 %v107_v36  ;;  %259 = vmatprep.mubr.f32.mxu0 %v2514_v0 }
  0x78   :  { %372 = vmatprep.mubr.f32.mxu1 %v2514_v0  ;;  %2034 = vmatpush1.bf16.msra.mxu1 %v2033_v60 }
  0x79   :  { %2036 = vmatprep.subr.bf16.mxu1 %v2035_v63 }
  0x7a   :  { %260 = vmatmul.mubr.f32.gmra.mrb[6].mxu0 %v108_v37 }
  0x7b   :  { %373 = vmatmul.mubr.f32.gmra.mrb[6].mxu1 %v108_v37  ;;  %265 = vmatprep.mubr.f32.mxu0 %v2514_v0 }
  0x7c   :  { %378 = vmatprep.mubr.f32.mxu1 %v2514_v0  ;;  %2038 = vmatpush1.bf16.msra.mxu1 %v2037_v5  ;;  %v510_v5 = vld [vmem:[%s3186_s4 + $0x30] sm:$0xff] }
  0x7d   :  { %2040 = vmatprep.subr.bf16.mxu1 %v2039_v6  ;;  %v515_v6 = vld [vmem:[%s3186_s4 + $0x58] sm:$0xff]  ;;  %v2057_v9 = vpack.c.bf16 %v510_v5, %v506_v4 }
  0x7e   :  { %266 = vmatmul.mubr.f32.gmra.mrb[8].mxu0 %v109_v38 }
  0x7f   :  { %379 = vmatmul.mubr.f32.gmra.mrb[8].mxu1 %v109_v38  ;;  %271 = vmatprep.mubr.f32.mxu0 %v2514_v0 }
  0x80   :  { %384 = vmatprep.mubr.f32.mxu1 %v2514_v0  ;;  %2042 = vmatpush1.bf16.msra.mxu1 %v2041_v11  ;;  %v2059_v11 = vpack.c.bf16 %v519_v7, %v515_v6 }
  0x81   :  { %2044 = vmatprep.subr.bf16.mxu1 %v2043_v12  ;;  %v514_v12 = vld [vmem:[%s3186_s4 + $0x50] sm:$0xff] }
  0x82   :  { %272 = vmatmul.mubr.f32.gmra.mrb[10].mxu0 %v110_v39 }
  0x83   :  { %385 = vmatmul.mubr.f32.gmra.mrb[10].mxu1 %v110_v39  ;;  %277 = vmatprep.mubr.f32.mxu0 %v2514_v0 }
  0x84   :  { %390 = vmatprep.mubr.f32.mxu1 %v2514_v0  ;;  %2046 = vmatpush1.bf16.msra.mxu1 %v2045_v15  ;;  %v527_v15 = vld [vmem:[%s3186_s4 + $0xb8] sm:$0xff] }
  0x86   :  { %278 = vmatmul.mubr.f32.gmra.mrb[12].mxu0 %v111_v40 }
  0x87   :  { %391 = vmatmul.mubr.f32.gmra.mrb[12].mxu1 %v111_v40  ;;  %283 = vmatprep.mubr.f32.mxu0 %v2514_v0 }
  0x88   :  { %396 = vmatprep.mubr.f32.mxu1 %v2514_v0 }
  0x8a   :  { %284 = vmatmul.mubr.f32.gmra.mrb[14].mxu0 %v112_v41 }
  0x8b   :  { %397 = vmatmul.mubr.f32.gmra.mrb[14].mxu1 %v112_v41  ;;  %475 = vmatprep.mubr.f32.mxu0 %v404_v42 }
  0x8c   :  { %632 = vmatprep.mubr.f32.mxu1 %v2514_v0 }
 0x141   :  { %v243_v16 = vpop.f32.mrb[0].mxu0 }
 0x142   :  { %v356_v17 = vpop.f32.mrb[0].mxu1  ;;  %v245_v18 = vpop.f32.mrb[1].mxu0 }
 0x143   :  { %v358_v19 = vpop.f32.mrb[1].mxu1 }
 0x145   :  { %v249_v20 = vpop.f32.mrb[2].mxu0 }
 0x146   :  { %v1993_v21 = vpack.c.bf16 %v249_v20, %v243_v16  ;;  %v362_v22 = vpop.f32.mrb[2].mxu1  ;;  %v251_v23 = vpop.f32.mrb[3].mxu0  ;;  %v405_v16 = vld [vmem:[%s3183_s1 + $0x10] sm:$0xff] }
 0x147   :  { %v1991_v24 = vpack.c.bf16 %v362_v22, %v356_v17  ;;  %v2009_v25 = vpack.c.bf16 %v251_v23, %v245_v18  ;;  %v364_v26 = vpop.f32.mrb[3].mxu1  ;;  %v2061_v17 = vpack.c.bf16 %v518_v13, %v514_v12  ;;  %v408_v18 = vld [vmem:[%s3183_s1 + $0x28] sm:$0xff]  ;;  %v522_v20 = vld [vmem:[%s3186_s4 + $0x90] sm:$0xff]  ;;  %v531_v22 = vld [vmem:[%s3186_s4 + $0xd8] sm:$0xff] }
 0x148   :  { %v2007_v27 = vpack.c.bf16 %v364_v26, %v358_v19  ;;  %v2063_v19 = vpack.c.bf16 %v527_v15, %v523_v14  ;;  %v535_v23 = vld [vmem:[%s3186_s4 + $0xf8] sm:$0xff] }
 0x149   :  { %1992 = vmatprep.subr.bf16.mxu0 %v1991_v24  ;;  %v255_v28 = vpop.f32.mrb[4].mxu0  ;;  %v407_v24 = vld [vmem:[%s3183_s1 + $0x20] sm:$0xff]  ;;  %v410_v26 = vld [vmem:[%s3183_s1 + $0x38] sm:$0xff] }
 0x14a   :  { %v368_v29 = vpop.f32.mrb[4].mxu1  ;;  %1994 = vmatpush3.bf16.msra.mxu0 %v1993_v21  ;;  %v257_v30 = vpop.f32.mrb[5].mxu0  ;;  %v526_v21 = vld [vmem:[%s3186_s4 + $0xb0] sm:$0xff] }
 0x14b   :  { %v370_v31 = vpop.f32.mrb[5].mxu1 }
 0x14d   :  { %v261_v32 = vpop.f32.mrb[6].mxu0 }
 0x14e   :  { %v1997_v33 = vpack.c.bf16 %v261_v32, %v255_v28  ;;  %v374_v34 = vpop.f32.mrb[6].mxu1  ;;  %v263_v35 = vpop.f32.mrb[7].mxu0  ;;  %v530_v28 = vld [vmem:[%s3186_s4 + $0xd0] sm:$0xff] }
 0x14f   :  { %v1995_v36 = vpack.c.bf16 %v374_v34, %v368_v29  ;;  %v2013_v37 = vpack.c.bf16 %v263_v35, %v257_v30  ;;  %v376_v38 = vpop.f32.mrb[7].mxu1  ;;  %v534_v29 = vld [vmem:[%s3186_s4 + $0xf0] sm:$0xff]  ;;  %v539_v30 = vld [vmem:[%s3186_s4 + $0x118] sm:$0xff] }
 0x150   :  { %v2011_v39 = vpack.c.bf16 %v376_v38, %v370_v31  ;;  %v543_v31 = vld [vmem:[%s3186_s4 + $0x138] sm:$0xff]  ;;  %v409_v32 = vld [vmem:[%s3183_s1 + $0x30] sm:$0xff] }
 0x151   :  { %1996 = vmatprep.subr.bf16.mxu0 %v1995_v36  ;;  %v267_v40 = vpop.f32.mrb[8].mxu0  ;;  %v2071_v34 = vpack.c.bf16 %v543_v31, %v539_v30  ;;  %v538_v35 = vld [vmem:[%s3186_s4 + $0x110] sm:$0xff]  ;;  %v551_v38 = vld [vmem:[%s3186_s4 + $0x178] sm:$0xff]  ;;  %v844_v31 = vld [vmem:[#allocation2 + $0x28] sm:$0xff] }
 0x152   :  { %v380_v41 = vpop.f32.mrb[8].mxu1  ;;  %1998 = vmatpush3.bf16.msra.mxu0 %v1997_v33  ;;  %v269_v42 = vpop.f32.mrb[9].mxu0  ;;  %v2069_v33 = vpack.c.bf16 %v534_v29, %v530_v28  ;;  %v542_v36 = vld [vmem:[%s3186_s4 + $0x130] sm:$0xff]  ;;  %v839_v28 = vld [vmem:[#allocation2] sm:$0xff] }
 0x153   :  { %v382_v43 = vpop.f32.mrb[9].mxu1  ;;  %v841_v30 = vld [vmem:[#allocation2 + $0x10] sm:$0xff] }
 0x155   :  { %v273_v44 = vpop.f32.mrb[10].mxu0 }
 0x156   :  { %v2001_v45 = vpack.c.bf16 %v273_v44, %v267_v40  ;;  %v386_v46 = vpop.f32.mrb[10].mxu1  ;;  %v275_v47 = vpop.f32.mrb[11].mxu0  ;;  %v553_v44 = vld [vmem:[%s3186_s4 + $0x188] sm:$0xff] }
 0x157   :  { %v1999_v48 = vpack.c.bf16 %v386_v46, %v380_v41  ;;  %v2017_v49 = vpack.c.bf16 %v275_v47, %v269_v42  ;;  %v388_v50 = vpop.f32.mrb[11].mxu1  ;;  %v546_v41 = vld [vmem:[%s3186_s4 + $0x150] sm:$0xff]  ;;  %v555_v46 = vld [vmem:[%s3186_s4 + $0x198] sm:$0xff] }
 0x158   :  { %v2015_v51 = vpack.c.bf16 %v388_v50, %v382_v43  ;;  %v550_v42 = vld [vmem:[%s3186_s4 + $0x170] sm:$0xff]  ;;  %v556_v50 = vld [vmem:[%s3186_s4 + $0x1a0] sm:$0xff] }
 0x159   :  { %2000 = vmatprep.subr.bf16.mxu0 %v1999_v48  ;;  %v279_v52 = vpop.f32.mrb[12].mxu0  ;;  %v2077_v43 = vpack.c.bf16 %v550_v42, %v546_v41  ;;  %v559_v48 = vld [vmem:[%s3186_s4 + $0x1b8] sm:$0xff]  ;;  %v847_v41 = vld [vmem:[#allocation2 + $0x40] sm:$0xff]  ;;  %v849_v42 = vld [vmem:[#allocation2 + $0x50] sm:$0xff] }
 0x15a   :  { %v392_v53 = vpop.f32.mrb[12].mxu1  ;;  %2002 = vmatpush3.bf16.msra.mxu0 %v2001_v45  ;;  %v281_v54 = vpop.f32.mrb[13].mxu0  ;;  %v557_v45 = vld [vmem:[%s3186_s4 + $0x1a8] sm:$0xff] }
 0x15b   :  { %v394_v55 = vpop.f32.mrb[13].mxu1  ;;  %v2047_v47 = vpack.c.bf16 %v557_v45, %v553_v44  ;;  %v854_v44 = vld [vmem:[#allocation2 + $0x78] sm:$0xff]  ;;  %v2129_v45 = vpack.c.bf16 %v849_v42, %v847_v41 }
 0x15d   :  { %v285_v56 = vpop.f32.mrb[14].mxu0  ;;  %2048 = vmatprep.subr.bf16.mxu1 %v2047_v47  ;;  %v851_v47 = vld [vmem:[#allocation2 + $0x60] sm:$0xff] }
 0x15e   :  { %v2005_v57 = vpack.c.bf16 %v285_v56, %v279_v52  ;;  %v398_v58 = vpop.f32.mrb[14].mxu1  ;;  %v287_v59 = vpop.f32.mrb[15].mxu0  ;;  %v561_v56 = vld [vmem:[%s3186_s4 + $0x1c8] sm:$0xff] }
 0x15f   :  { %v2003_v60 = vpack.c.bf16 %v398_v58, %v392_v53  ;;  %v2021_v61 = vpack.c.bf16 %v287_v59, %v281_v54  ;;  %v400_v62 = vpop.f32.mrb[15].mxu1  ;;  %v554_v53 = vld [vmem:[%s3186_s4 + $0x190] sm:$0xff]  ;;  %v563_v58 = vld [vmem:[%s3186_s4 + $0x1d8] sm:$0xff] }
 0x160   :  { %v2019_v63 = vpack.c.bf16 %v400_v62, %v394_v55  ;;  %v558_v54 = vld [vmem:[%s3186_s4 + $0x1b0] sm:$0xff]  ;;  %v564_v62 = vld [vmem:[%s3186_s4 + $0x1e0] sm:$0xff] }
 0x161   :  { %2004 = vmatprep.subr.bf16.mxu0 %v2003_v60  ;;  %v2081_v55 = vpack.c.bf16 %v558_v54, %v554_v53  ;;  %v567_v60 = vld [vmem:[%s3186_s4 + $0x1f8] sm:$0xff]  ;;  %v855_v53 = vld [vmem:[#allocation2 + $0x80] sm:$0xff]  ;;  %v857_v54 = vld [vmem:[#allocation2 + $0x90] sm:$0xff] }
 0x162   :  { %2006 = vmatpush3.bf16.msra.mxu0 %v2005_v57  ;;  %v565_v57 = vld [vmem:[%s3186_s4 + $0x1e8] sm:$0xff] }
 0x163   :  { %2008 = vmatprep.subr.bf16.mxu0 %v2007_v27  ;;  %v2067_v27 = vpack.c.bf16 %v535_v23, %v531_v22  ;;  %v2051_v59 = vpack.c.bf16 %v565_v57, %v561_v56  ;;  %v862_v56 = vld [vmem:[#allocation2 + $0xb8] sm:$0xff]  ;;  %v2137_v57 = vpack.c.bf16 %v857_v54, %v855_v53 }
 0x166   :  { %2010 = vmatpush3.bf16.msra.mxu0 %v2009_v25  ;;  %v2065_v25 = vpack.c.bf16 %v526_v21, %v522_v20 }
 0x167   :  { %2012 = vmatprep.subr.bf16.mxu0 %v2011_v39  ;;  %v2073_v39 = vpack.c.bf16 %v542_v36, %v538_v35  ;;  %v843_v35 = vld [vmem:[#allocation2 + $0x20] sm:$0xff]  ;;  %v845_v36 = vld [vmem:[#allocation2 + $0x30] sm:$0xff] }
 0x16a   :  { %2014 = vmatpush3.bf16.msra.mxu0 %v2013_v37  ;;  %v547_v37 = vld [vmem:[%s3186_s4 + $0x158] sm:$0xff] }
 0x16b   :  { %2016 = vmatprep.subr.bf16.mxu0 %v2015_v51  ;;  %v2075_v40 = vpack.c.bf16 %v551_v38, %v547_v37  ;;  %v2079_v51 = vpack.c.bf16 %v559_v48, %v555_v46  ;;  %v848_v37 = vld [vmem:[#allocation2 + $0x48] sm:$0xff]  ;;  %v850_v38 = vld [vmem:[#allocation2 + $0x58] sm:$0xff]  ;;  %v853_v48 = vld [vmem:[#allocation2 + $0x70] sm:$0xff] }
 0x16e   :  { %2018 = vmatpush3.bf16.msra.mxu0 %v2017_v49  ;;  %v552_v49 = vld [vmem:[%s3186_s4 + $0x180] sm:$0xff] }
 0x16f   :  { %2020 = vmatprep.subr.bf16.mxu0 %v2019_v63  ;;  %v2049_v52 = vpack.c.bf16 %v556_v50, %v552_v49  ;;  %v2083_v63 = vpack.c.bf16 %v567_v60, %v563_v58  ;;  %v856_v49 = vld [vmem:[#allocation2 + $0x88] sm:$0xff]  ;;  %v858_v50 = vld [vmem:[#allocation2 + $0x98] sm:$0xff]  ;;  %v861_v60 = vld [vmem:[#allocation2 + $0xb0] sm:$0xff] }
 0x171   :  { %2050 = vmatpush1.bf16.msra.mxu1 %v2049_v52  ;;  %v2135_v52 = vpack.c.bf16 %v858_v50, %v856_v49 }
 0x172   :  { %2022 = vmatpush3.bf16.msra.mxu0 %v2021_v61  ;;  %v560_v61 = vld [vmem:[%s3186_s4 + $0x1c0] sm:$0xff]  ;;  %2052 = vmatprep.subr.bf16.mxu1 %v2051_v59 }
 0x173   :  { %2056 = vmatprep.subr.bf16.mxu0 %v2055_v3  ;;  %v2053_v1 = vpack.c.bf16 %v564_v62, %v560_v61  ;;  %v566_v3 = vld [vmem:[%s3186_s4 + $0x1f0] sm:$0xff]  ;;  %v859_v59 = vld [vmem:[#allocation2 + $0xa0] sm:$0xff]  ;;  %v864_v61 = vld [vmem:[#allocation2 + $0xc8] sm:$0xff] }
 0x174   :  { %v2085_v4 = vpack.c.bf16 %v566_v3, %v562_v2  ;;  %v866_v62 = vld [vmem:[#allocation2 + $0xd8] sm:$0xff]  ;;  %v863_v2 = vld [vmem:[#allocation2 + $0xc0] sm:$0xff]  ;;  %v865_v3 = vld [vmem:[#allocation2 + $0xd0] sm:$0xff] }
 0x175   :  { %476 = vmatmul.mubr.f32.vlgmr.msra.gmra.mrb[16].mxu0 %v403_v8  ;;  %2054 = vmatpush1.bf16.msra.mxu1 %v2053_v1  ;;  %v2143_v1 = vpack.c.bf16 %v866_v62, %v864_v61  ;;  %v890_v61 = vld [vmem:[#allocation2 + $0x198] sm:$0xff] }
 0x176   :  { %480 = vmatprep.mubr.f32.mxu0 %v406_v10  ;;  %2058 = vmatpush1.bf16.msra.mxu0 %v2057_v9 }
 0x177   :  { %2060 = vmatprep.subr.bf16.mxu0 %v2059_v11 }
 0x179   :  { %481 = vmatmul.mubr.f32.gmra.mrb[18].mxu0 %v405_v16 }
 0x17a   :  { %485 = vmatprep.mubr.f32.mxu0 %v408_v18  ;;  %2062 = vmatpush1.bf16.msra.mxu0 %v2061_v17 }
 0x17b   :  { %2064 = vmatprep.subr.bf16.mxu0 %v2063_v19 }
 0x17d   :  { %486 = vmatmul.mubr.f32.gmra.mrb[20].mxu0 %v407_v24 }
 0x17e   :  { %490 = vmatprep.mubr.f32.mxu0 %v410_v26  ;;  %2066 = vmatpush1.bf16.msra.mxu0 %v2065_v25  ;;  %v746_v25 = vld [vmem:[%s3185_s3] sm:$0xff]  ;;  %v840_v26 = vld [vmem:[#allocation2 + $0x8] sm:$0xff] }
 0x17f   :  { %2068 = vmatprep.subr.bf16.mxu0 %v2067_v27  ;;  %v842_v27 = vld [vmem:[#allocation2 + $0x18] sm:$0xff] }
 0x180   :  { %v2119_v29 = vpack.c.bf16 %v842_v27, %v840_v26  ;;  %v879_v26 = vld [vmem:[#allocation2 + $0x140] sm:$0xff]  ;;  %v881_v27 = vld [vmem:[#allocation2 + $0x150] sm:$0xff] }
 0x181   :  { %491 = vmatmul.mubr.f32.gmra.mrb[22].mxu0 %v409_v32  ;;  %v846_v32 = vld [vmem:[#allocation2 + $0x38] sm:$0xff] }
 0x182   :  { %2070 = vmatpush1.bf16.msra.mxu0 %v2069_v33  ;;  %721 = vmatprep.mubr.f32.mxu0 %v2514_v0  ;;  %v2121_v33 = vpack.c.bf16 %v841_v30, %v839_v28  ;;  %v884_v28 = vld [vmem:[#allocation2 + $0x168] sm:$0xff]  ;;  %v2161_v30 = vpack.c.bf16 %v881_v27, %v879_v26 }
 0x183   :  { %2072 = vmatprep.subr.bf16.mxu0 %v2071_v34  ;;  %v2123_v34 = vpack.c.bf16 %v846_v32, %v844_v31 }
 0x186   :  { %2074 = vmatpush1.bf16.msra.mxu0 %v2073_v39  ;;  %v2125_v39 = vpack.c.bf16 %v845_v36, %v843_v35 }
 0x187   :  { %2076 = vmatprep.subr.bf16.mxu0 %v2075_v40  ;;  %v2127_v40 = vpack.c.bf16 %v850_v38, %v848_v37 }
 0x18a   :  { %2078 = vmatpush1.bf16.msra.mxu0 %v2077_v43  ;;  %v852_v43 = vld [vmem:[#allocation2 + $0x68] sm:$0xff] }
 0x18b   :  { %2080 = vmatprep.subr.bf16.mxu0 %v2079_v51  ;;  %v2131_v46 = vpack.c.bf16 %v854_v44, %v852_v43  ;;  %v2133_v51 = vpack.c.bf16 %v853_v48, %v851_v47 }
 0x18e   :  { %2082 = vmatpush1.bf16.msra.mxu0 %v2081_v55  ;;  %v860_v55 = vld [vmem:[#allocation2 + $0xa8] sm:$0xff] }
 0x18f   :  { %2084 = vmatprep.subr.bf16.mxu0 %v2083_v63  ;;  %v2139_v58 = vpack.c.bf16 %v862_v56, %v860_v55  ;;  %v2141_v63 = vpack.c.bf16 %v861_v60, %v859_v59  ;;  %v747_v56 = vld [vmem:[%s3185_s3 + $0x8] sm:$0xff] }
 0x190   :  { %v888_v60 = vld [vmem:[#allocation2 + $0x188] sm:$0xff] }
 0x191   :  { %v2167_v62 = vpack.c.bf16 %v890_v61, %v888_v60  ;;  %v1036_v60 = vld [vmem:[#allocation4 + $0xc0] sm:$0xff] }
 0x192   :  { %2086 = vmatpush1.bf16.msra.mxu0 %v2085_v4  ;;  %v868_v4 = vld [vmem:[#allocation2 + $0xe8] sm:$0xff]  ;;  %v1040_v61 = vld [vmem:[#allocation4 + $0xe0] sm:$0xff] }
 0x193   :  { %2120 = vmatprep.subr.bf16.mxu0 %v2119_v29  ;;  %v886_v29 = vld [vmem:[#allocation2 + $0x178] sm:$0xff] }
 0x194   :  { %v2163_v31 = vpack.c.bf16 %v886_v29, %v884_v28 }
 0x248   :  { %v1818_v5 = vpop.f32.mrb[16].mxu0 }
 0x249   :  { %v1819_v6 = vpop.f32.mrb[17].mxu0 }
 0x24a   :  { %v1820_v7 = vadd.f32 %v1819_v6, %v1818_v5  ;;  %v870_v5 = vld [vmem:[#allocation2 + $0xf8] sm:$0xff]  ;;  %v2145_v6 = vpack.c.bf16 %v865_v3, %v863_v2  ;;  %v892_v3 = vld [vmem:[#allocation2 + $0x1a8] sm:$0xff] }
 0x24c   :  { %v496_v8 = vmul.f32 0.2, %v1820_v7  ;;  %v1821_v9 = vpop.f32.mrb[18].mxu0 }
 0x24d   :  { %v1822_v10 = vpop.f32.mrb[19].mxu0 }
 0x24e   :  { %v500_v11 = vmax.f32 %v1820_v7, %v496_v8  ;;  %v1823_v12 = vadd.f32 %v1822_v10, %v1821_v9  ;;  %v2147_v7 = vpack.c.bf16 %v870_v5, %v868_v4  ;;  %v867_v8 = vld [vmem:[#allocation2 + $0xe0] sm:$0xff]  ;;  %v869_v9 = vld [vmem:[#allocation2 + $0xf0] sm:$0xff]  ;;  %v872_v10 = vld [vmem:[#allocation2 + $0x108] sm:$0xff] }
 0x24f   :  { %v894_v4 = vld [vmem:[#allocation2 + $0x1b8] sm:$0xff] }
 0x250   :  { %v497_v13 = vmul.f32 0.2, %v1823_v12  ;;  %v1824_v14 = vpop.f32.mrb[20].mxu0  ;;  %633 = vmatmul.mubr.f32.vlgmr.msra.gmra.mrb[16].mxu1 %v500_v11  ;;  %722 = vmatmul.mubr.f32.vlgmr.msra.gmra.mrb[24].mxu0 %v500_v11  ;;  %v874_v11 = vld [vmem:[#allocation2 + $0x118] sm:$0xff]  ;;  %v2171_v5 = vpack.c.bf16 %v894_v4, %v892_v3  ;;  %v1044_v3 = vld [vmem:[#allocation4 + $0x100] sm:$0xff] }
 0x251   :  { %v1825_v15 = vpop.f32.mrb[21].mxu0  ;;  %638 = vmatprep.mubr.f32.mxu1 %v2514_v0  ;;  %727 = vmatprep.mubr.f32.mxu0 %v2514_v0  ;;  %v1048_v4 = vld [vmem:[#allocation4 + $0x120] sm:$0xff] }
 0x252   :  { %v501_v16 = vmax.f32 %v1823_v12, %v497_v13  ;;  %v1826_v17 = vadd.f32 %v1825_v15, %v1824_v14  ;;  %2122 = vmatpush1.bf16.msra.mxu0 %v2121_v33  ;;  %v2149_v12 = vpack.c.bf16 %v869_v9, %v867_v8  ;;  %v2151_v13 = vpack.c.bf16 %v874_v11, %v872_v10  ;;  %v871_v14 = vld [vmem:[#allocation2 + $0x100] sm:$0xff]  ;;  %v873_v15 = vld [vmem:[#allocation2 + $0x110] sm:$0xff]  ;;  %v896_v9 = vld [vmem:[#allocation2 + $0x1c8] sm:$0xff] }
 0x253   :  { %2124 = vmatprep.subr.bf16.mxu0 %v2123_v34  ;;  %v898_v10 = vld [vmem:[#allocation2 + $0x1d8] sm:$0xff] }
 0x254   :  { %v498_v18 = vmul.f32 0.2, %v1826_v17  ;;  %v1827_v19 = vpop.f32.mrb[22].mxu0  ;;  %639 = vmatmul.mubr.f32.gmra.mrb[18].mxu1 %v501_v16  ;;  %728 = vmatmul.mubr.f32.gmra.mrb[26].mxu0 %v501_v16  ;;  %v876_v16 = vld [vmem:[#allocation2 + $0x128] sm:$0xff]  ;;  %v2175_v11 = vpack.c.bf16 %v898_v10, %v896_v9  ;;  %v1052_v9 = vld [vmem:[#allocation4 + $0x140] sm:$0xff] }
 0x255   :  { %v1828_v20 = vpop.f32.mrb[23].mxu0  ;;  %644 = vmatprep.mubr.f32.mxu1 %v2514_v0  ;;  %733 = vmatprep.mubr.f32.mxu0 %v2514_v0  ;;  %v1056_v10 = vld [vmem:[#allocation4 + $0x160] sm:$0xff] }
 0x256   :  { %v502_v21 = vmax.f32 %v1826_v17, %v498_v18  ;;  %v1829_v22 = vadd.f32 %v1828_v20, %v1827_v19  ;;  %2126 = vmatpush1.bf16.msra.mxu0 %v2125_v39  ;;  %v878_v17 = vld [vmem:[#allocation2 + $0x138] sm:$0xff]  ;;  %v2153_v18 = vpack.c.bf16 %v873_v15, %v871_v14  ;;  %v875_v20 = vld [vmem:[#allocation2 + $0x120] sm:$0xff]  ;;  %v900_v15 = vld [vmem:[#allocation2 + $0x1e8] sm:$0xff] }
 0x257   :  { %2128 = vmatprep.subr.bf16.mxu0 %v2127_v40  ;;  %v2155_v19 = vpack.c.bf16 %v878_v17, %v876_v16  ;;  %v902_v16 = vld [vmem:[#allocation2 + $0x1f8] sm:$0xff] }
 0x258   :  { %v499_v23 = vmul.f32 0.2, %v1829_v22  ;;  %645 = vmatmul.mubr.f32.gmra.mrb[20].mxu1 %v502_v21  ;;  %734 = vmatmul.mubr.f32.gmra.mrb[28].mxu0 %v502_v21  ;;  %v877_v21 = vld [vmem:[#allocation2 + $0x130] sm:$0xff]  ;;  %v2179_v17 = vpack.c.bf16 %v902_v16, %v900_v15  ;;  %v1064_v16 = vld [vmem:[#allocation4 + $0x1a0] sm:$0xff] }
 0x259   :  { %650 = vmatprep.mubr.f32.mxu1 %v2514_v0  ;;  %739 = vmatprep.mubr.f32.mxu0 %v2514_v0 }
 0x25a   :  { %v503_v24 = vmax.f32 %v1829_v22, %v499_v23  ;;  %2130 = vmatpush1.bf16.msra.mxu0 %v2129_v45  ;;  %v880_v22 = vld [vmem:[#allocation2 + $0x148] sm:$0xff]  ;;  %v882_v23 = vld [vmem:[#allocation2 + $0x158] sm:$0xff] }
 0x25b   :  { %2132 = vmatprep.subr.bf16.mxu0 %v2131_v46 }
 0x25c   :  { %651 = vmatmul.mubr.f32.gmra.mrb[22].mxu1 %v503_v24  ;;  %740 = vmatmul.mubr.f32.gmra.mrb[30].mxu0 %v503_v24  ;;  %v2157_v24 = vpack.c.bf16 %v877_v21, %v875_v20  ;;  %v1013_v21 = vld [vmem:[#allocation4 + $0x8] sm:$0xff] }
 0x25d   :  { %1894 = vmatprep.mubr.f32.mxu1 %v746_v25  ;;  %v2159_v25 = vpack.c.bf16 %v882_v23, %v880_v22  ;;  %v1017_v22 = vld [vmem:[#allocation4 + $0x28] sm:$0xff]  ;;  %v1012_v23 = vld [vmem:[#allocation4] sm:$0xff] }
 0x25e   :  { %2134 = vmatpush1.bf16.msra.mxu0 %v2133_v51 }
 0x25f   :  { %2136 = vmatprep.subr.bf16.mxu0 %v2135_v52 }
 0x262   :  { %2138 = vmatpush1.bf16.msra.mxu0 %v2137_v57  ;;  %v883_v57 = vld [vmem:[#allocation2 + $0x160] sm:$0xff] }
 0x263   :  { %2140 = vmatprep.subr.bf16.mxu0 %v2139_v58  ;;  %v885_v58 = vld [vmem:[#allocation2 + $0x170] sm:$0xff] }
 0x264   :  { %v2165_v59 = vpack.c.bf16 %v885_v58, %v883_v57  ;;  %v1037_v57 = vld [vmem:[#allocation4 + $0xc8] sm:$0xff] }
 0x265   :  { %v1041_v58 = vld [vmem:[#allocation4 + $0xe8] sm:$0xff] }
 0x266   :  { %2142 = vmatpush1.bf16.msra.mxu0 %v2141_v63  ;;  %v887_v63 = vld [vmem:[#allocation2 + $0x180] sm:$0xff] }
 0x267   :  { %2144 = vmatprep.subr.bf16.mxu0 %v2143_v1  ;;  %v889_v1 = vld [vmem:[#allocation2 + $0x190] sm:$0xff] }
 0x268   :  { %v2169_v2 = vpack.c.bf16 %v889_v1, %v887_v63  ;;  %v1045_v63 = vld [vmem:[#allocation4 + $0x108] sm:$0xff] }
 0x269   :  { %v1049_v1 = vld [vmem:[#allocation4 + $0x128] sm:$0xff] }
 0x26a   :  { %2146 = vmatpush1.bf16.msra.mxu0 %v2145_v6  ;;  %v891_v6 = vld [vmem:[#allocation2 + $0x1a0] sm:$0xff] }
 0x26b   :  { %2148 = vmatprep.subr.bf16.mxu0 %v2147_v7  ;;  %v893_v7 = vld [vmem:[#allocation2 + $0x1b0] sm:$0xff] }
 0x26c   :  { %v2173_v8 = vpack.c.bf16 %v893_v7, %v891_v6  ;;  %v1053_v6 = vld [vmem:[#allocation4 + $0x148] sm:$0xff] }
 0x26d   :  { %v1057_v7 = vld [vmem:[#allocation4 + $0x168] sm:$0xff] }
 0x26e   :  { %2150 = vmatpush1.bf16.msra.mxu0 %v2149_v12  ;;  %v895_v12 = vld [vmem:[#allocation2 + $0x1c0] sm:$0xff] }
 0x26f   :  { %2152 = vmatprep.subr.bf16.mxu0 %v2151_v13  ;;  %v897_v13 = vld [vmem:[#allocation2 + $0x1d0] sm:$0xff] }
 0x270   :  { %v2177_v14 = vpack.c.bf16 %v897_v13, %v895_v12  ;;  %v1061_v12 = vld [vmem:[#allocation4 + $0x188] sm:$0xff] }
 0x271   :  { %v1065_v13 = vld [vmem:[#allocation4 + $0x1a8] sm:$0xff] }
 0x272   :  { %2154 = vmatpush1.bf16.msra.mxu0 %v2153_v18  ;;  %v899_v18 = vld [vmem:[#allocation2 + $0x1e0] sm:$0xff]  ;;  %v2207_v15 = vpack.c.bf16 %v1065_v13, %v1061_v12  ;;  %v1046_v13 = vld [vmem:[#allocation4 + $0x110] sm:$0xff] }
 0x273   :  { %2156 = vmatprep.subr.bf16.mxu0 %v2155_v19  ;;  %v901_v19 = vld [vmem:[#allocation2 + $0x1f0] sm:$0xff] }
 0x274   :  { %v2181_v20 = vpack.c.bf16 %v901_v19, %v899_v18  ;;  %v1073_v18 = vld [vmem:[#allocation4 + $0x1e8] sm:$0xff] }
 0x276   :  { %2158 = vmatpush1.bf16.msra.mxu0 %v2157_v24  ;;  %v2183_v24 = vpack.c.bf16 %v1017_v22, %v1013_v21  ;;  %v1068_v21 = vld [vmem:[#allocation4 + $0x1c0] sm:$0xff] }
 0x277   :  { %2160 = vmatprep.subr.bf16.mxu0 %v2159_v25  ;;  %v1016_v25 = vld [vmem:[#allocation4 + $0x20] sm:$0xff] }
 0x278   :  { %v2185_v26 = vpack.c.bf16 %v1016_v25, %v1012_v23  ;;  %v1072_v22 = vld [vmem:[#allocation4 + $0x1e0] sm:$0xff]  ;;  %v1015_v23 = vld [vmem:[#allocation4 + $0x18] sm:$0xff] }
 0x279   :  { %v2213_v25 = vpack.c.bf16 %v1072_v22, %v1068_v21  ;;  %v1063_v21 = vld [vmem:[#allocation4 + $0x198] sm:$0xff] }
 0x27a   :  { %2162 = vmatpush1.bf16.msra.mxu0 %v2161_v30  ;;  %v1067_v22 = vld [vmem:[#allocation4 + $0x1b8] sm:$0xff] }
 0x27b   :  { %2164 = vmatprep.subr.bf16.mxu0 %v2163_v31 }
 0x27e   :  { %2166 = vmatpush1.bf16.msra.mxu0 %v2165_v59  ;;  %v2195_v59 = vpack.c.bf16 %v1041_v58, %v1037_v57  ;;  %v1022_v57 = vld [vmem:[#allocation4 + $0x50] sm:$0xff] }
 0x27f   :  { %2168 = vmatprep.subr.bf16.mxu0 %v2167_v62  ;;  %v2197_v62 = vpack.c.bf16 %v1040_v61, %v1036_v60  ;;  %v1026_v58 = vld [vmem:[#allocation4 + $0x70] sm:$0xff]  ;;  %v1035_v60 = vld [vmem:[#allocation4 + $0xb8] sm:$0xff] }
 0x280   :  { %v2221_v61 = vpack.c.bf16 %v1026_v58, %v1022_v57  ;;  %v1330_v57 = vld [vmem:[#allocation6 + $0x60] sm:$0xff]  ;;  %v1332_v58 = vld [vmem:[#allocation6 + $0x70] sm:$0xff] }
 0x282   :  { %2170 = vmatpush1.bf16.msra.mxu0 %v2169_v2  ;;  %v2199_v2 = vpack.c.bf16 %v1049_v1, %v1045_v63  ;;  %v1030_v1 = vld [vmem:[#allocation4 + $0x90] sm:$0xff] }
 0x283   :  { %2172 = vmatprep.subr.bf16.mxu0 %v2171_v5  ;;  %v2201_v5 = vpack.c.bf16 %v1048_v4, %v1044_v3  ;;  %v1039_v3 = vld [vmem:[#allocation4 + $0xd8] sm:$0xff] }
 0x284   :  { %v1043_v4 = vld [vmem:[#allocation4 + $0xf8] sm:$0xff] }
 0x286   :  { %2174 = vmatpush1.bf16.msra.mxu0 %v2173_v8  ;;  %v2203_v8 = vpack.c.bf16 %v1057_v7, %v1053_v6  ;;  %v2227_v6 = vpack.c.bf16 %v1043_v4, %v1039_v3  ;;  %v1038_v7 = vld [vmem:[#allocation4 + $0xd0] sm:$0xff]  ;;  %v1341_v3 = vld [vmem:[#allocation6 + $0xb8] sm:$0xff] }
 0x287   :  { %2176 = vmatprep.subr.bf16.mxu0 %v2175_v11  ;;  %v2205_v11 = vpack.c.bf16 %v1056_v10, %v1052_v9  ;;  %v1047_v9 = vld [vmem:[#allocation4 + $0x118] sm:$0xff] }
 0x288   :  { %v1051_v10 = vld [vmem:[#allocation4 + $0x138] sm:$0xff] }
 0x289   :  { %v2231_v12 = vpack.c.bf16 %v1051_v10, %v1047_v9  ;;  %v1345_v9 = vld [vmem:[#allocation6 + $0xd8] sm:$0xff] }
 0x28a   :  { %2178 = vmatpush1.bf16.msra.mxu0 %v2177_v14  ;;  %v1060_v14 = vld [vmem:[#allocation4 + $0x180] sm:$0xff] }
 0x28b   :  { %2180 = vmatprep.subr.bf16.mxu0 %v2179_v17  ;;  %v1069_v17 = vld [vmem:[#allocation4 + $0x1c8] sm:$0xff]  ;;  %v2209_v19 = vpack.c.bf16 %v1064_v16, %v1060_v14  ;;  %v1050_v14 = vld [vmem:[#allocation4 + $0x130] sm:$0xff]  ;;  %v1059_v16 = vld [vmem:[#allocation4 + $0x178] sm:$0xff] }
 0x28e   :  { %2182 = vmatpush1.bf16.msra.mxu0 %v2181_v20  ;;  %v2211_v20 = vpack.c.bf16 %v1073_v18, %v1069_v17  ;;  %v2233_v17 = vpack.c.bf16 %v1050_v14, %v1046_v13  ;;  %v1344_v13 = vld [vmem:[#allocation6 + $0xd0] sm:$0xff]  ;;  %v1347_v14 = vld [vmem:[#allocation6 + $0xe8] sm:$0xff] }
 0x323   :  { %v634_v32 = vpop.f32.mrb[16].mxu1  ;;  %v723_v33 = vpop.f32.mrb[24].mxu0 }
 0x324   :  { %v636_v34 = vpop.f32.mrb[17].mxu1  ;;  %v725_v35 = vpop.f32.mrb[25].mxu0 }
 0x327   :  { %v640_v36 = vpop.f32.mrb[18].mxu1  ;;  %v729_v37 = vpop.f32.mrb[26].mxu0 }
 0x328   :  { %v2087_v38 = vpack.c.bf16 %v640_v36, %v634_v32  ;;  %v2103_v39 = vpack.c.bf16 %v729_v37, %v723_v33  ;;  %v642_v40 = vpop.f32.mrb[19].mxu1  ;;  %v731_v41 = vpop.f32.mrb[27].mxu0 }
 0x329   :  { %v2095_v42 = vpack.c.bf16 %v642_v40, %v636_v34  ;;  %v2111_v43 = vpack.c.bf16 %v731_v41, %v725_v35 }
 0x32a   :  { %2088 = vmatprep.subr.bf16.mxu1 %v2087_v38 }
 0x32b   :  { %v646_v44 = vpop.f32.mrb[20].mxu1  ;;  %v735_v45 = vpop.f32.mrb[28].mxu0  ;;  %2090 = vmatpush3.bf16.msra.mxu1 %v2087_v38 }
 0x32c   :  { %v648_v46 = vpop.f32.mrb[21].mxu1  ;;  %v737_v47 = vpop.f32.mrb[29].mxu0 }
 0x32f   :  { %v652_v48 = vpop.f32.mrb[22].mxu1  ;;  %v741_v49 = vpop.f32.mrb[30].mxu0 }
 0x330   :  { %v2091_v50 = vpack.c.bf16 %v652_v48, %v646_v44  ;;  %v2107_v51 = vpack.c.bf16 %v741_v49, %v735_v45  ;;  %v654_v52 = vpop.f32.mrb[23].mxu1  ;;  %v743_v53 = vpop.f32.mrb[31].mxu0  ;;  %v1021_v45 = vld [vmem:[#allocation4 + $0x48] sm:$0xff]  ;;  %v1020_v48 = vld [vmem:[#allocation4 + $0x40] sm:$0xff] }
 0x331   :  { %v2099_v54 = vpack.c.bf16 %v654_v52, %v648_v46  ;;  %v2115_v55 = vpack.c.bf16 %v743_v53, %v737_v47  ;;  %v1025_v46 = vld [vmem:[#allocation4 + $0x68] sm:$0xff]  ;;  %v1024_v49 = vld [vmem:[#allocation4 + $0x60] sm:$0xff] }
 0x332   :  { %2092 = vmatprep.subr.bf16.mxu1 %v2091_v50  ;;  %v2187_v47 = vpack.c.bf16 %v1025_v46, %v1021_v45  ;;  %v1033_v52 = vld [vmem:[#allocation4 + $0xa8] sm:$0xff]  ;;  %v1781_v45 = vld [vmem:[%s3189_s7] ss:$0 sm:$0xff] }
 0x333   :  { %2094 = vmatpush3.bf16.msra.mxu1 %v2091_v50  ;;  %v2189_v50 = vpack.c.bf16 %v1024_v49, %v1020_v48  ;;  %v1018_v48 = vld [vmem:[#allocation4 + $0x30] sm:$0xff] }
 0x334   :  { %2096 = vmatprep.subr.bf16.mxu1 %v2095_v42 }
 0x337   :  { %2098 = vmatpush3.bf16.msra.mxu1 %v2095_v42 }
 0x338   :  { %2100 = vmatprep.subr.bf16.mxu1 %v2099_v54 }
 0x33b   :  { %2102 = vmatpush3.bf16.msra.mxu1 %v2099_v54  ;;  %v1028_v54 = vld [vmem:[#allocation4 + $0x80] sm:$0xff] }
 0x33c   :  { %2104 = vmatprep.subr.bf16.mxu1 %v2103_v39 }
 0x33f   :  { %2106 = vmatpush3.bf16.msra.mxu1 %v2103_v39 }
 0x340   :  { %2108 = vmatprep.subr.bf16.mxu1 %v2107_v51 }
 0x343   :  { %2110 = vmatpush3.bf16.msra.mxu1 %v2107_v51  ;;  %v1029_v51 = vld [vmem:[#allocation4 + $0x88] sm:$0xff] }
 0x344   :  { %2112 = vmatprep.subr.bf16.mxu1 %v2111_v43  ;;  %v2191_v53 = vpack.c.bf16 %v1033_v52, %v1029_v51  ;;  %v1027_v51 = vld [vmem:[#allocation4 + $0x78] sm:$0xff] }
 0x347   :  { %2114 = vmatpush3.bf16.msra.mxu1 %v2111_v43 }
 0x348   :  { %2116 = vmatprep.subr.bf16.mxu1 %v2115_v55 }
 0x34b   :  { %2118 = vmatpush3.bf16.msra.mxu1 %v2115_v55  ;;  %v1032_v55 = vld [vmem:[#allocation4 + $0xa0] sm:$0xff] }
 0x34c   :  { %2184 = vmatprep.subr.bf16.mxu1 %v2183_v24  ;;  %v1019_v24 = vld [vmem:[#allocation4 + $0x38] sm:$0xff] }
 0x34e   :  { %1895 = vmatmul.mubr.f32.vlgmr.msra.gmra.mrb[24].mxu1 %v747_v56  ;;  %v2193_v56 = vpack.c.bf16 %v1032_v55, %v1028_v54 }
 0x34f   :  { %1140 = vmatprep.mubr.f32.mxu1 %v2514_v0  ;;  %2186 = vmatpush1.bf16.msra.mxu1 %v2185_v26  ;;  %v2215_v26 = vpack.c.bf16 %v1019_v24, %v1015_v23  ;;  %v2239_v24 = vpack.c.bf16 %v1067_v22, %v1063_v21  ;;  %v1353_v21 = vld [vmem:[#allocation6 + $0x118] sm:$0xff] }
 0x350   :  { %2188 = vmatprep.subr.bf16.mxu1 %v2187_v47 }
 0x353   :  { %2190 = vmatpush1.bf16.msra.mxu1 %v2189_v50  ;;  %v1023_v50 = vld [vmem:[#allocation4 + $0x58] sm:$0xff] }
 0x354   :  { %2192 = vmatprep.subr.bf16.mxu1 %v2191_v53  ;;  %v2219_v55 = vpack.c.bf16 %v1027_v51, %v1023_v50  ;;  %v1326_v51 = vld [vmem:[#allocation6 + $0x40] sm:$0xff] }
 0x357   :  { %2194 = vmatpush1.bf16.msra.mxu1 %v2193_v56 }
 0x358   :  { %2196 = vmatprep.subr.bf16.mxu1 %v2195_v59  ;;  %v1031_v59 = vld [vmem:[#allocation4 + $0x98] sm:$0xff] }
 0x359   :  { %v2223_v63 = vpack.c.bf16 %v1035_v60, %v1031_v59  ;;  %v1335_v59 = vld [vmem:[#allocation6 + $0x88] sm:$0xff]  ;;  %v1337_v60 = vld [vmem:[#allocation6 + $0x98] sm:$0xff] }
 0x35b   :  { %2198 = vmatpush1.bf16.msra.mxu1 %v2197_v62 }
 0x35c   :  { %2200 = vmatprep.subr.bf16.mxu1 %v2199_v2  ;;  %v1034_v2 = vld [vmem:[#allocation4 + $0xb0] sm:$0xff] }
 0x35f   :  { %2202 = vmatpush1.bf16.msra.mxu1 %v2201_v5  ;;  %v2225_v5 = vpack.c.bf16 %v1034_v2, %v1030_v1  ;;  %v1336_v1 = vld [vmem:[#allocation6 + $0x90] sm:$0xff]  ;;  %v1339_v2 = vld [vmem:[#allocation6 + $0xa8] sm:$0xff] }
 0x360   :  { %2204 = vmatprep.subr.bf16.mxu1 %v2203_v8  ;;  %v1042_v8 = vld [vmem:[#allocation4 + $0xf0] sm:$0xff] }
 0x363   :  { %2206 = vmatpush1.bf16.msra.mxu1 %v2205_v11  ;;  %v2229_v11 = vpack.c.bf16 %v1042_v8, %v1038_v7  ;;  %v1340_v7 = vld [vmem:[#allocation6 + $0xb0] sm:$0xff]  ;;  %v1343_v8 = vld [vmem:[#allocation6 + $0xc8] sm:$0xff] }
 0x364   :  { %2208 = vmatprep.subr.bf16.mxu1 %v2207_v15  ;;  %v1055_v15 = vld [vmem:[#allocation4 + $0x158] sm:$0xff] }
 0x365   :  { %v2235_v18 = vpack.c.bf16 %v1059_v16, %v1055_v15  ;;  %v1349_v15 = vld [vmem:[#allocation6 + $0xf8] sm:$0xff] }
 0x367   :  { %2210 = vmatpush1.bf16.msra.mxu1 %v2209_v19  ;;  %v1054_v19 = vld [vmem:[#allocation4 + $0x150] sm:$0xff] }
 0x368   :  { %2212 = vmatprep.subr.bf16.mxu1 %v2211_v20  ;;  %v1058_v20 = vld [vmem:[#allocation4 + $0x170] sm:$0xff] }
 0x369   :  { %v2237_v23 = vpack.c.bf16 %v1058_v20, %v1054_v19  ;;  %v1348_v19 = vld [vmem:[#allocation6 + $0xf0] sm:$0xff]  ;;  %v1351_v20 = vld [vmem:[#allocation6 + $0x108] sm:$0xff] }
 0x36b   :  { %2214 = vmatpush1.bf16.msra.mxu1 %v2213_v25  ;;  %v1062_v25 = vld [vmem:[#allocation4 + $0x190] sm:$0xff] }
 0x36c   :  { %2216 = vmatprep.subr.bf16.mxu1 %v2215_v26  ;;  %v1066_v26 = vld [vmem:[#allocation4 + $0x1b0] sm:$0xff] }
 0x421   :  { %v3121_v27 = vpop.f32.mrb[24].mxu1 }
 0x422   :  { %v831_v28 = vmul.f32 %v3121_v27, %v3121_v27  ;;  %v3125_v29 = vpop.f32.mrb[25].mxu1 }
 0x423   :  { %v823_v30 = vadd.f32 %v3121_v27, %v3125_v29  ;;  %v830_v31 = vmul.f32 %v3125_v29, %v3125_v29 }
 0x425   :  { %v824_v32 = vrot.slane %v823_v30, 4  ;;  %v832_v33 = vadd.f32 %v831_v28, %v830_v31  ;;  %v976_v28 = vlaneseq }
 0x427   :  { %v825_v34 = vadd.f32 %v824_v32, %v823_v30  ;;  %v833_v35 = vrot.slane %v832_v33, 4  ;;  %v977_v30 = vshrl.u32 %v976_v28, 7  ;;  %v1071_v28 = vld [vmem:[#allocation4 + $0x1d8] sm:$0xff] }
 0x429   :  { %v826_v36 = vrot.slane %v825_v34, 2  ;;  %v834_v37 = vadd.f32 %v833_v35, %v832_v33  ;;  %v3131_v31 = vsub.s32 0, %v977_v30  ;;  %v1075_v30 = vld [vmem:[#allocation4 + $0x1f8] sm:$0xff] }
 0x42b   :  { %v827_v38 = vadd.f32 %v826_v36, %v825_v34  ;;  %v835_v39 = vrot.slane %v834_v37, 2 }
 0x42d   :  { %v836_v40 = vadd.f32 %v835_v39, %v834_v37  ;;  %v828_v41 = vrot.slane %v827_v38, 1 }
 0x42f   :  { %v837_v42 = vrot.slane %v836_v40, 1  ;;  %v829_v44 = vadd.f32 %v828_v41, %v827_v38 }
 0x431   :  { %v838_v43 = vadd.f32 %v837_v42, %v836_v40  ;;  %v1780_v42 = vld [vmem:[%s3188_s6] ss:$0 sm:$0xff] }
 0x433   :  { %967 = vmatprep.mubr.f32.mxu0 %v838_v43 }
 0x434   :  { %968 = vmatmul.mubr.f32.vlgmr.msra.gmra.mrb[32].mxu0 %v829_v44 }
 0x435   :  { %1913 = vmatprep.mubr.msk.f32.mxu0 %vm2516_vm0, %v2514_v0 }
 0x507   :  { %v969_v32 = vpop.f32.mrb[32].mxu0 }
 0x508   :  { %v974_v33 = vmul.f32 %v969_v32, %v969_v32  ;;  %v979_v34 = vrot.slane %v969_v32, %v3131_v31  ;;  %v971_v35 = vpop.f32.mrb[33].mxu0  ;;  %v2241_v32 = vpack.c.bf16 %v1066_v26, %v1062_v25  ;;  %v1352_v25 = vld [vmem:[#allocation6 + $0x110] sm:$0xff]  ;;  %v1355_v26 = vld [vmem:[#allocation6 + $0x128] sm:$0xff] }
 0x50a   :  { %v980_v36 = vsub.f32 %v3125_v29, %v979_v34  ;;  %v981_v37 = vsub.f32 %v3121_v27, %v979_v34  ;;  %v975_v38 = vsub.f32 %v971_v35, %v974_v33  ;;  %v1014_v27 = vld [vmem:[#allocation4 + $0x10] sm:$0xff]  ;;  %v2243_v33 = vpack.c.bf16 %v1075_v30, %v1071_v28  ;;  %v1357_v28 = vld [vmem:[#allocation6 + $0x138] sm:$0xff] }
 0x50b   :  { %v2217_v53 = vpack.c.bf16 %v1018_v48, %v1014_v27  ;;  %v1070_v34 = vld [vmem:[#allocation4 + $0x1d0] sm:$0xff]  ;;  %v1327_v27 = vld [vmem:[#allocation6 + $0x48] sm:$0xff]  ;;  %v1329_v48 = vld [vmem:[#allocation6 + $0x58] sm:$0xff] }
 0x50c   :  { %v982_v39 = vadd.f32 1e-05, %v975_v38  ;;  %v1074_v35 = vld [vmem:[#allocation4 + $0x1f0] sm:$0xff]  ;;  %v1319_v38 = vld [vmem:[#allocation6 + $0x8] sm:$0xff]  ;;  %v2267_v50 = vpack.c.bf16 %v1329_v48, %v1327_v27 }
 0x50e   :  { %2404 = vrsqrt.f32 %v982_v39  ;;  %v1321_v39 = vld [vmem:[#allocation6 + $0x18] sm:$0xff] }
 0x518   :  { %v2405_v40 = vpop.eup %2404 }
 0x519   :  { %v987_v41 = vrot.slane %v2405_v40, %v3131_v31  ;;  %v1318_v40 = vld [vmem:[#allocation6] sm:$0xff] }
 0x51b   :  { %v988_v43 = vmul.f32 %v987_v41, %v980_v36  ;;  %v989_v44 = vmul.f32 %v987_v41, %v981_v37  ;;  %v2245_v36 = vpack.c.bf16 %v1074_v35, %v1070_v34  ;;  %v2515_v37 = vmov 0.0|0.0   ;;  %v1356_v34 = vld [vmem:[#allocation6 + $0x130] sm:$0xff]  ;;  %v1359_v35 = vld [vmem:[#allocation6 + $0x148] sm:$0xff] }
 0x51c   :  { %2247 = vmatprep.subr.bf16.mxu0 %v2515_v37  ;;  %v2259_v41 = vpack.c.bf16 %v1321_v39, %v1319_v38 }
 0x51d   :  { %v997_v46 = vmul.f32 %v1780_v42, %v988_v43  ;;  %v998_v29 = vmul.f32 %v1780_v42, %v989_v44  ;;  %v1320_v42 = vld [vmem:[#allocation6 + $0x10] sm:$0xff]  ;;  %v1323_v43 = vld [vmem:[#allocation6 + $0x28] sm:$0xff]  ;;  %v1325_v44 = vld [vmem:[#allocation6 + $0x38] sm:$0xff] }
 0x51f   :  { %v1006_v47 = vadd.f32 %v1781_v45, %v997_v46  ;;  %v1007_v49 = vadd.f32 %v1781_v45, %v998_v29  ;;  %v2261_v45 = vpack.c.bf16 %v1320_v42, %v1318_v40  ;;  %v2263_v46 = vpack.c.bf16 %v1325_v44, %v1323_v43  ;;  %v1322_v29 = vld [vmem:[#allocation6 + $0x20] sm:$0xff]  ;;  %v1363_v42 = vld [vmem:[#allocation6 + $0x168] sm:$0xff]  ;;  %v1365_v43 = vld [vmem:[#allocation6 + $0x178] sm:$0xff] }
 0x520   :  { %v1358_v40 = vld [vmem:[#allocation6 + $0x140] sm:$0xff] }
 0x521   :  { %v1008_v52 = vmul.f32 0.2, %v1006_v47  ;;  %v1009_v56 = vmul.f32 0.2, %v1007_v49 }
 0x523   :  { %v1010_v54 = vmax.f32 %v1006_v47, %v1008_v52  ;;  %v1011_v62 = vmax.f32 %v1007_v49, %v1009_v56  ;;  %v1324_v47 = vld [vmem:[#allocation6 + $0x30] sm:$0xff] }
 0x524   :  { %v2265_v49 = vpack.c.bf16 %v1324_v47, %v1322_v29  ;;  %v1328_v52 = vld [vmem:[#allocation6 + $0x50] sm:$0xff] }
 0x525   :  { %1141 = vmatmul.mubr.f32.vlgmr.msra.gmra.mrb[26].mxu1 %v1010_v54  ;;  %v1364_v29 = vld [vmem:[#allocation6 + $0x170] sm:$0xff] }
 0x526   :  { %2218 = vmatpush1.bf16.msra.mxu1 %v2217_v53  ;;  %1146 = vmatprep.mubr.f32.mxu1 %v2514_v0  ;;  %v1331_v53 = vld [vmem:[#allocation6 + $0x68] sm:$0xff] }
 0x527   :  { %2220 = vmatprep.subr.bf16.mxu1 %v2219_v55  ;;  %v2269_v55 = vpack.c.bf16 %v1328_v52, %v1326_v51 }
 0x529   :  { %1147 = vmatmul.mubr.f32.gmra.mrb[28].mxu1 %v1011_v62 }
 0x52a   :  { %2222 = vmatpush1.bf16.msra.mxu1 %v2221_v61  ;;  %1217 = vmatprep.mubr.f32.mxu1 %v2514_v0  ;;  %v2273_v61 = vpack.c.bf16 %v1332_v58, %v1330_v57 }
 0x52b   :  { %2224 = vmatprep.subr.bf16.mxu1 %v2223_v63  ;;  %v1334_v63 = vld [vmem:[#allocation6 + $0x80] sm:$0xff] }
 0x52c   :  { %v2277_v4 = vpack.c.bf16 %v1336_v1, %v1334_v63  ;;  %v1366_v63 = vld [vmem:[#allocation6 + $0x180] sm:$0xff]  ;;  %v1368_v1 = vld [vmem:[#allocation6 + $0x190] sm:$0xff] }
 0x52e   :  { %2226 = vmatpush1.bf16.msra.mxu1 %v2225_v5  ;;  %v2279_v5 = vpack.c.bf16 %v1341_v3, %v1339_v2  ;;  %v2309_v2 = vpack.c.bf16 %v1368_v1, %v1366_v63  ;;  %v1371_v3 = vld [vmem:[#allocation6 + $0x1a8] sm:$0xff] }
 0x52f   :  { %2228 = vmatprep.subr.bf16.mxu1 %v2227_v6  ;;  %v1338_v6 = vld [vmem:[#allocation6 + $0xa0] sm:$0xff]  ;;  %v1522_v63 = vld [vmem:[#allocation7 + $0x128] sm:$0xff] }
 0x530   :  { %v2281_v10 = vpack.c.bf16 %v1340_v7, %v1338_v6  ;;  %v1370_v6 = vld [vmem:[#allocation6 + $0x1a0] sm:$0xff]  ;;  %v1372_v7 = vld [vmem:[#allocation6 + $0x1b0] sm:$0xff] }
 0x532   :  { %2230 = vmatpush1.bf16.msra.mxu1 %v2229_v11  ;;  %v2283_v11 = vpack.c.bf16 %v1345_v9, %v1343_v8  ;;  %v2313_v8 = vpack.c.bf16 %v1372_v7, %v1370_v6  ;;  %v1375_v9 = vld [vmem:[#allocation6 + $0x1c8] sm:$0xff] }
 0x533   :  { %2232 = vmatprep.subr.bf16.mxu1 %v2231_v12  ;;  %v1342_v12 = vld [vmem:[#allocation6 + $0xc0] sm:$0xff]  ;;  %v1530_v6 = vld [vmem:[#allocation7 + $0x168] sm:$0xff] }
 0x534   :  { %v2285_v16 = vpack.c.bf16 %v1344_v13, %v1342_v12  ;;  %v1374_v12 = vld [vmem:[#allocation6 + $0x1c0] sm:$0xff]  ;;  %v1376_v13 = vld [vmem:[#allocation6 + $0x1d0] sm:$0xff] }
 0x536   :  { %2234 = vmatpush1.bf16.msra.mxu1 %v2233_v17  ;;  %v2287_v17 = vpack.c.bf16 %v1349_v15, %v1347_v14  ;;  %v2317_v14 = vpack.c.bf16 %v1376_v13, %v1374_v12  ;;  %v1379_v15 = vld [vmem:[#allocation6 + $0x1e8] sm:$0xff]  ;;  %v1533_v13 = vld [vmem:[#allocation7 + $0x180] sm:$0xff] }
 0x537   :  { %2236 = vmatprep.subr.bf16.mxu1 %v2235_v18  ;;  %v1346_v18 = vld [vmem:[#allocation6 + $0xe0] sm:$0xff]  ;;  %v1538_v12 = vld [vmem:[#allocation7 + $0x1a8] sm:$0xff] }
 0x538   :  { %v2289_v22 = vpack.c.bf16 %v1348_v19, %v1346_v18  ;;  %v1378_v18 = vld [vmem:[#allocation6 + $0x1e0] sm:$0xff]  ;;  %v1380_v19 = vld [vmem:[#allocation6 + $0x1f0] sm:$0xff] }
 0x53a   :  { %2238 = vmatpush1.bf16.msra.mxu1 %v2237_v23  ;;  %v2291_v23 = vpack.c.bf16 %v1353_v21, %v1351_v20  ;;  %v2321_v20 = vpack.c.bf16 %v1380_v19, %v1378_v18  ;;  %v1486_v21 = vld [vmem:[#allocation7 + $0x8] sm:$0xff] }
 0x53b   :  { %2240 = vmatprep.subr.bf16.mxu1 %v2239_v24  ;;  %v1350_v24 = vld [vmem:[#allocation6 + $0x100] sm:$0xff] }
 0x53c   :  { %v2293_v30 = vpack.c.bf16 %v1352_v25, %v1350_v24  ;;  %v1489_v25 = vld [vmem:[#allocation7 + $0x20] sm:$0xff] }
 0x53e   :  { %2242 = vmatpush1.bf16.msra.mxu1 %v2241_v32  ;;  %v2295_v32 = vpack.c.bf16 %v1357_v28, %v1355_v26 }
 0x53f   :  { %2244 = vmatprep.subr.bf16.mxu1 %v2243_v33  ;;  %v1354_v33 = vld [vmem:[#allocation6 + $0x120] sm:$0xff] }
 0x540   :  { %v2297_v38 = vpack.c.bf16 %v1356_v34, %v1354_v33 }
 0x542   :  { %2246 = vmatpush1.bf16.msra.mxu1 %v2245_v36  ;;  %v1361_v36 = vld [vmem:[#allocation6 + $0x158] sm:$0xff] }
 0x543   :  { %2260 = vmatprep.subr.bf16.mxu1 %v2259_v41  ;;  %v2299_v39 = vpack.c.bf16 %v1361_v36, %v1359_v35  ;;  %v1360_v41 = vld [vmem:[#allocation6 + $0x150] sm:$0xff] }
 0x544   :  { %v2301_v44 = vpack.c.bf16 %v1360_v41, %v1358_v40 }
 0x545   :  { %1218 = vmatmul.mubr.f32.vlgmr.msra.gmra.mrb[30].mxu1 %v1010_v54  ;;  %v1333_v54 = vld [vmem:[#allocation6 + $0x78] sm:$0xff] }
 0x546   :  { %1223 = vmatprep.mubr.f32.mxu1 %v2514_v0  ;;  %2262 = vmatpush1.bf16.msra.mxu1 %v2261_v45  ;;  %v2271_v56 = vpack.c.bf16 %v1333_v54, %v1331_v53  ;;  %v2303_v45 = vpack.c.bf16 %v1365_v43, %v1363_v42 }
 0x547   :  { %2264 = vmatprep.subr.bf16.mxu1 %v2263_v46  ;;  %v1362_v46 = vld [vmem:[#allocation6 + $0x160] sm:$0xff] }
 0x548   :  { %v2305_v47 = vpack.c.bf16 %v1364_v29, %v1362_v46  ;;  %v1494_v46 = vld [vmem:[#allocation7 + $0x48] sm:$0xff] }
 0x549   :  { %1224 = vmatmul.mubr.f32.gmra.mrb[32].mxu1 %v1011_v62  ;;  %v2275_v62 = vpack.c.bf16 %v1337_v60, %v1335_v59  ;;  %v1230_v59 = vld [vmem:[%s3190_s8] sm:$0xff]  ;;  %v1367_v60 = vld [vmem:[#allocation6 + $0x188] sm:$0xff] }
 0x54a   :  { %2266 = vmatpush1.bf16.msra.mxu1 %v2265_v49  ;;  %v1498_v29 = vld [vmem:[#allocation7 + $0x68] sm:$0xff] }
 0x54b   :  { %2268 = vmatprep.subr.bf16.mxu1 %v2267_v50 }
 0x54e   :  { %2270 = vmatpush1.bf16.msra.mxu1 %v2269_v55 }
 0x54f   :  { %2272 = vmatprep.subr.bf16.mxu1 %v2271_v56 }
 0x552   :  { %2274 = vmatpush1.bf16.msra.mxu1 %v2273_v61  ;;  %v1369_v61 = vld [vmem:[#allocation6 + $0x198] sm:$0xff] }
 0x553   :  { %2276 = vmatprep.subr.bf16.mxu1 %v2275_v62  ;;  %v2307_v62 = vpack.c.bf16 %v1369_v61, %v1367_v60  ;;  %v1513_v60 = vld [vmem:[#allocation7 + $0xe0] sm:$0xff] }
 0x556   :  { %2278 = vmatpush1.bf16.msra.mxu1 %v2277_v4  ;;  %v1373_v4 = vld [vmem:[#allocation6 + $0x1b8] sm:$0xff] }
 0x557   :  { %2280 = vmatprep.subr.bf16.mxu1 %v2279_v5  ;;  %v2311_v5 = vpack.c.bf16 %v1373_v4, %v1371_v3  ;;  %v1521_v3 = vld [vmem:[#allocation7 + $0x120] sm:$0xff] }
 0x55a   :  { %2282 = vmatpush1.bf16.msra.mxu1 %v2281_v10  ;;  %v1377_v10 = vld [vmem:[#allocation6 + $0x1d8] sm:$0xff] }
 0x55b   :  { %2284 = vmatprep.subr.bf16.mxu1 %v2283_v11  ;;  %v2315_v11 = vpack.c.bf16 %v1377_v10, %v1375_v9  ;;  %v1529_v9 = vld [vmem:[#allocation7 + $0x160] sm:$0xff] }
 0x55e   :  { %2286 = vmatpush1.bf16.msra.mxu1 %v2285_v16  ;;  %v1381_v16 = vld [vmem:[#allocation6 + $0x1f8] sm:$0xff] }
 0x55f   :  { %2288 = vmatprep.subr.bf16.mxu1 %v2287_v17  ;;  %v2319_v17 = vpack.c.bf16 %v1381_v16, %v1379_v15  ;;  %v1537_v15 = vld [vmem:[#allocation7 + $0x1a0] sm:$0xff]  ;;  %v1542_v16 = vld [vmem:[#allocation7 + $0x1c8] sm:$0xff] }
 0x560   :  { %v2349_v18 = vpack.c.bf16 %v1537_v15, %v1533_v13  ;;  %v1535_v15 = vld [vmem:[#allocation7 + $0x190] sm:$0xff] }
 0x562   :  { %2290 = vmatpush1.bf16.msra.mxu1 %v2289_v22  ;;  %v1490_v22 = vld [vmem:[#allocation7 + $0x28] sm:$0xff] }
 0x563   :  { %2292 = vmatprep.subr.bf16.mxu1 %v2291_v23  ;;  %v1485_v23 = vld [vmem:[#allocation7] sm:$0xff]  ;;  %v2323_v24 = vpack.c.bf16 %v1490_v22, %v1486_v21  ;;  %v1488_v22 = vld [vmem:[#allocation7 + $0x18] sm:$0xff] }
 0x564   :  { %v2325_v26 = vpack.c.bf16 %v1489_v25, %v1485_v23  ;;  %v1545_v21 = vld [vmem:[#allocation7 + $0x1e0] sm:$0xff]  ;;  %v1492_v23 = vld [vmem:[#allocation7 + $0x38] sm:$0xff] }
 0x565   :  { %v2355_v25 = vpack.c.bf16 %v1492_v23, %v1488_v22  ;;  %v1547_v22 = vld [vmem:[#allocation7 + $0x1f0] sm:$0xff] }
 0x566   :  { %2294 = vmatpush1.bf16.msra.mxu1 %v2293_v30 }
 0x567   :  { %2296 = vmatprep.subr.bf16.mxu1 %v2295_v32 }
 0x56a   :  { %2298 = vmatpush1.bf16.msra.mxu1 %v2297_v38 }
 0x56b   :  { %2300 = vmatprep.subr.bf16.mxu1 %v2299_v39 }
 0x56e   :  { %2302 = vmatpush1.bf16.msra.mxu1 %v2301_v44 }
 0x56f   :  { %2304 = vmatprep.subr.bf16.mxu1 %v2303_v45 }
 0x572   :  { %2306 = vmatpush1.bf16.msra.mxu1 %v2305_v47  ;;  %v2327_v47 = vpack.c.bf16 %v1498_v29, %v1494_v46  ;;  %v1491_v46 = vld [vmem:[#allocation7 + $0x30] sm:$0xff]  ;;  %v1500_v29 = vld [vmem:[#allocation7 + $0x78] sm:$0xff] }
 0x573   :  { %2308 = vmatprep.subr.bf16.mxu1 %v2307_v62  ;;  %v1518_v62 = vld [vmem:[#allocation7 + $0x108] sm:$0xff] }
 0x574   :  { %v2339_v1 = vpack.c.bf16 %v1522_v63, %v1518_v62  ;;  %v1515_v62 = vld [vmem:[#allocation7 + $0xf0] sm:$0xff]  ;;  %v1520_v63 = vld [vmem:[#allocation7 + $0x118] sm:$0xff] }
 0x576   :  { %2310 = vmatpush1.bf16.msra.mxu1 %v2309_v2  ;;  %v1517_v2 = vld [vmem:[#allocation7 + $0x100] sm:$0xff] }
 0x577   :  { %2312 = vmatprep.subr.bf16.mxu1 %v2311_v5  ;;  %v2341_v4 = vpack.c.bf16 %v1521_v3, %v1517_v2  ;;  %v1526_v5 = vld [vmem:[#allocation7 + $0x148] sm:$0xff] }
 0x578   :  { %v2343_v7 = vpack.c.bf16 %v1530_v6, %v1526_v5  ;;  %v1528_v5 = vld [vmem:[#allocation7 + $0x158] sm:$0xff] }
 0x579   :  { %v1532_v6 = vld [vmem:[#allocation7 + $0x178] sm:$0xff] }
 0x57a   :  { %2314 = vmatpush1.bf16.msra.mxu1 %v2313_v8  ;;  %v1525_v8 = vld [vmem:[#allocation7 + $0x140] sm:$0xff] }
 0x57b   :  { %2316 = vmatprep.subr.bf16.mxu1 %v2315_v11  ;;  %v2345_v10 = vpack.c.bf16 %v1529_v9, %v1525_v8  ;;  %v1534_v11 = vld [vmem:[#allocation7 + $0x188] sm:$0xff]  ;;  %v2375_v8 = vpack.c.bf16 %v1532_v6, %v1528_v5  ;;  %v1527_v9 = vld [vmem:[#allocation7 + $0x150] sm:$0xff] }
 0x57e   :  { %2318 = vmatpush1.bf16.msra.mxu1 %v2317_v14  ;;  %v2347_v14 = vpack.c.bf16 %v1538_v12, %v1534_v11  ;;  %v1536_v11 = vld [vmem:[#allocation7 + $0x198] sm:$0xff] }
 0x57f   :  { %2320 = vmatprep.subr.bf16.mxu1 %v2319_v17  ;;  %v1546_v17 = vld [vmem:[#allocation7 + $0x1e8] sm:$0xff]  ;;  %v1540_v12 = vld [vmem:[#allocation7 + $0x1b8] sm:$0xff] }
 0x580   :  { %v2351_v19 = vpack.c.bf16 %v1546_v17, %v1542_v16  ;;  %v1539_v16 = vld [vmem:[#allocation7 + $0x1b0] sm:$0xff]  ;;  %v1544_v17 = vld [vmem:[#allocation7 + $0x1d8] sm:$0xff] }
 0x582   :  { %2322 = vmatpush1.bf16.msra.mxu1 %v2321_v20  ;;  %v1541_v20 = vld [vmem:[#allocation7 + $0x1c0] sm:$0xff] }
 0x583   :  { %2387 = vmatprep.subr.bf16.mxu1 %v2515_v37 }
 0x5f8   :  { %v1142_v27 = vpop.f32.mrb[26].mxu1 }
 0x5f9   :  { %v1144_v48 = vpop.f32.mrb[27].mxu1 }
 0x5fc   :  { %v1148_v49 = vpop.f32.mrb[28].mxu1 }
 0x5fd   :  { %v2248_v50 = vpack.c.bf16 %v1148_v49, %v1142_v27  ;;  %v1150_v51 = vpop.f32.mrb[29].mxu1  ;;  %v1493_v27 = vld [vmem:[#allocation7 + $0x40] sm:$0xff] }
 0x5fe   :  { %v2251_v52 = vpack.c.bf16 %v1150_v51, %v1144_v48  ;;  %v1497_v48 = vld [vmem:[#allocation7 + $0x60] sm:$0xff]  ;;  %v1506_v51 = vld [vmem:[#allocation7 + $0xa8] sm:$0xff] }
 0x5ff   :  { %2249 = vmatpush3.bf16.msra.mxu0 %v2248_v50  ;;  %v2329_v49 = vpack.c.bf16 %v1497_v48, %v1493_v27  ;;  %v1502_v50 = vld [vmem:[#allocation7 + $0x88] sm:$0xff] }
 0x600   :  { %2250 = vmatprep.subr.bf16.mxu0 %v2515_v37 }
 0x603   :  { %2252 = vmatpush3.bf16.msra.mxu0 %v2251_v52  ;;  %v2331_v52 = vpack.c.bf16 %v1506_v51, %v1502_v50  ;;  %v1499_v50 = vld [vmem:[#allocation7 + $0x70] sm:$0xff]  ;;  %v1504_v51 = vld [vmem:[#allocation7 + $0x98] sm:$0xff] }
 0x604   :  { %2253 = vmatprep.subr.bf16.mxu0 %v2515_v37 }
 0x618   :  { %v1219_v53 = vpop.f32.mrb[30].mxu1 }
 0x619   :  { %v1221_v54 = vpop.f32.mrb[31].mxu1 }
 0x61c   :  { %v1225_v55 = vpop.f32.mrb[32].mxu1 }
 0x61d   :  { %v2254_v56 = vpack.c.bf16 %v1225_v55, %v1219_v53  ;;  %v1227_v57 = vpop.f32.mrb[33].mxu1  ;;  %v1501_v53 = vld [vmem:[#allocation7 + $0x80] sm:$0xff] }
 0x61e   :  { %v2257_v58 = vpack.c.bf16 %v1227_v57, %v1221_v54  ;;  %v1505_v54 = vld [vmem:[#allocation7 + $0xa0] sm:$0xff]  ;;  %v1514_v57 = vld [vmem:[#allocation7 + $0xe8] sm:$0xff] }
 0x61f   :  { %2255 = vmatpush3.bf16.msra.mxu0 %v2254_v56  ;;  %v2333_v55 = vpack.c.bf16 %v1505_v54, %v1501_v53  ;;  %v1510_v56 = vld [vmem:[#allocation7 + $0xc8] sm:$0xff] }
 0x620   :  { %2256 = vmatprep.subr.bf16.mxu0 %v2515_v37 }
 0x623   :  { %2258 = vmatpush3.bf16.msra.mxu0 %v2257_v58  ;;  %v2335_v58 = vpack.c.bf16 %v1514_v57, %v1510_v56  ;;  %v1507_v56 = vld [vmem:[#allocation7 + $0xb0] sm:$0xff]  ;;  %v1512_v57 = vld [vmem:[#allocation7 + $0xd8] sm:$0xff] }
 0x624   :  { %2324 = vmatprep.subr.bf16.mxu0 %v2323_v24  ;;  %v2353_v24 = vpack.c.bf16 %v1545_v21, %v1541_v20  ;;  %v1543_v21 = vld [vmem:[#allocation7 + $0x1d0] sm:$0xff] }
 0x625   :  { %v2385_v23 = vpack.c.bf16 %v1547_v22, %v1543_v21 }
 0x626   :  { %1914 = vmatmul.mubr.msk.f32.vlgmr.msra.gmra.mrb[34].mxu0 %vm1231_vm1, %v1230_v59  ;;  %v1509_v59 = vld [vmem:[#allocation7 + $0xc0] sm:$0xff] }
 0x627   :  { %1613 = vmatprep.mubr.f32.mxu0 %v2514_v0  ;;  %2326 = vmatpush1.bf16.msra.mxu0 %v2325_v26  ;;  %v2337_v61 = vpack.c.bf16 %v1513_v60, %v1509_v59 }
 0x628   :  { %2328 = vmatprep.subr.bf16.mxu0 %v2327_v47 }
 0x62b   :  { %2330 = vmatpush1.bf16.msra.mxu0 %v2329_v49 }
 0x62c   :  { %2332 = vmatprep.subr.bf16.mxu0 %v2331_v52  ;;  %v1508_v52 = vld [vmem:[#allocation7 + $0xb8] sm:$0xff] }
 0x62d   :  { %v2363_v54 = vpack.c.bf16 %v1508_v52, %v1504_v51 }
 0x62f   :  { %2334 = vmatpush1.bf16.msra.mxu0 %v2333_v55  ;;  %v1503_v55 = vld [vmem:[#allocation7 + $0x90] sm:$0xff] }
 0x630   :  { %2336 = vmatprep.subr.bf16.mxu0 %v2335_v58  ;;  %v1516_v58 = vld [vmem:[#allocation7 + $0xf8] sm:$0xff]  ;;  %v2365_v59 = vpack.c.bf16 %v1507_v56, %v1503_v55 }
 0x631   :  { %v2367_v60 = vpack.c.bf16 %v1516_v58, %v1512_v57 }
 0x633   :  { %2338 = vmatpush1.bf16.msra.mxu0 %v2337_v61  ;;  %v1511_v61 = vld [vmem:[#allocation7 + $0xd0] sm:$0xff] }
 0x634   :  { %2340 = vmatprep.subr.bf16.mxu0 %v2339_v1  ;;  %v1524_v1 = vld [vmem:[#allocation7 + $0x138] sm:$0xff]  ;;  %v2369_v2 = vpack.c.bf16 %v1515_v62, %v1511_v61 }
 0x635   :  { %v2371_v3 = vpack.c.bf16 %v1524_v1, %v1520_v63 }
 0x637   :  { %2342 = vmatpush1.bf16.msra.mxu0 %v2341_v4  ;;  %v1519_v4 = vld [vmem:[#allocation7 + $0x110] sm:$0xff] }
 0x638   :  { %2344 = vmatprep.subr.bf16.mxu0 %v2343_v7 }
 0x63b   :  { %2346 = vmatpush1.bf16.msra.mxu0 %v2345_v10  ;;  %v1531_v10 = vld [vmem:[#allocation7 + $0x170] sm:$0xff] }
 0x63c   :  { %2348 = vmatprep.subr.bf16.mxu0 %v2347_v14  ;;  %v2377_v13 = vpack.c.bf16 %v1531_v10, %v1527_v9  ;;  %v2379_v14 = vpack.c.bf16 %v1540_v12, %v1536_v11 }
 0x63f   :  { %2350 = vmatpush1.bf16.msra.mxu0 %v2349_v18  ;;  %v1548_v18 = vld [vmem:[#allocation7 + $0x1f8] sm:$0xff] }
 0x640   :  { %2352 = vmatprep.subr.bf16.mxu0 %v2351_v19  ;;  %v2381_v19 = vpack.c.bf16 %v1539_v16, %v1535_v15  ;;  %v2383_v20 = vpack.c.bf16 %v1548_v18, %v1544_v17 }
 0x643   :  { %2354 = vmatpush1.bf16.msra.mxu0 %v2353_v24 }
 0x644   :  { %2356 = vmatprep.subr.bf16.mxu0 %v2355_v25 }
 0x6f9   :  { %v3157_v28 = vpop.f32.mrb[34].mxu0 }
 0x6fa   :  { %v1305_v30 = vrot.slane %v3157_v28, 4  ;;  %v1311_v32 = vmul.f32 %v3157_v28, %v3157_v28  ;;  %v1915_v33 = vpop.f32.mrb[35].mxu0 }
 0x6fc   :  { %v1306_v34 = vadd.f32 %v1305_v30, %v3157_v28  ;;  %v1312_v35 = vrot.slane %v1311_v32, 4 }
 0x6fe   :  { %v1307_v36 = vrot.slane %v1306_v34, 2  ;;  %v1313_v38 = vadd.f32 %v1312_v35, %v1311_v32 }
 0x700   :  { %v1308_v39 = vadd.f32 %v1307_v36, %v1306_v34  ;;  %v1314_v40 = vrot.slane %v1313_v38, 2 }
 0x702   :  { %v1315_v41 = vadd.f32 %v1314_v40, %v1313_v38  ;;  %v1309_v42 = vrot.slane %v1308_v39, 1  ;;  %v1783_v40 = vld [vmem:[%s3193_s11] ss:$0 sm:$0xff] }
 0x704   :  { %v1316_v43 = vrot.slane %v1315_v41, 1  ;;  %v1310_v45 = vadd.f32 %v1309_v42, %v1308_v39  ;;  %v1784_v42 = vld [vmem:[%s3194_s12] ss:$0 sm:$0xff] }
 0x706   :  { %v1317_v44 = vadd.f32 %v1316_v43, %v1315_v41 }
 0x708   :  { %1446 = vmatprep.mubr.f32.mxu1 %v1317_v44 }
 0x709   :  { %1447 = vmatmul.mubr.f32.vlgmr.msra.gmra.mrb[34].mxu1 %v1310_v45  ;;  %v1487_v45 = vld [vmem:[#allocation7 + $0x10] sm:$0xff] }
 0x70a   :  { %1924 = vmatprep.mubr.msk.f32.mxu1 %vm2516_vm0, %v2514_v0  ;;  %v2357_v27 = vpack.c.bf16 %v1491_v46, %v1487_v45 }
 0x7dc   :  { %v1448_v26 = vpop.f32.mrb[34].mxu1 }
 0x7dd   :  { %v1453_v30 = vmul.f32 %v1448_v26, %v1448_v26  ;;  %v1458_v32 = vrot.slane %v1448_v26, %v3131_v31  ;;  %v1450_v33 = vpop.f32.mrb[35].mxu1 }
 0x7df   :  { %v1459_v34 = vsub.f32 %v3157_v28, %v1458_v32  ;;  %v1454_v35 = vsub.f32 %v1450_v33, %v1453_v30  ;;  %v1496_v28 = vld [vmem:[#allocation7 + $0x58] sm:$0xff] }
 0x7e0   :  { %v2359_v49 = vpack.c.bf16 %v1500_v29, %v1496_v28 }
 0x7e1   :  { %v1460_v36 = vadd.f32 1e-05, %v1454_v35 }
 0x7e3   :  { %2406 = vrsqrt.f32 %v1460_v36 }
 0x7ed   :  { %v2407_v38 = vpop.eup %2406 }
 0x7ee   :  { %v1465_v39 = vrot.slane %v2407_v38, %v3131_v31  ;;  %v1495_v31 = vld [vmem:[#allocation7 + $0x50] sm:$0xff] }
 0x7ef   :  { %v2361_v53 = vpack.c.bf16 %v1499_v50, %v1495_v31 }
 0x7f0   :  { %v1466_v41 = vmul.f32 %v1465_v39, %v1459_v34  ;;  %v1691_v34 = vld [vmem:[%s3195_s13] sm:$0x3] }
 0x7f2   :  { %v1474_v43 = vmul.f32 %v1783_v40, %v1466_v41 }
 0x7f4   :  { %v1482_v44 = vadd.f32 %v1784_v42, %v1474_v43 }
 0x7f6   :  { %v1483_v47 = vmul.f32 0.2, %v1482_v44 }
 0x7f8   :  { %v1484_v48 = vmax.f32 %v1482_v44, %v1483_v47 }
 0x7fa   :  { %1614 = vmatmul.mubr.f32.vlgmr.msra.gmra.mrb[36].mxu0 %v1484_v48 }
 0x7fb   :  { %2358 = vmatpush1.bf16.msra.mxu0 %v2357_v27  ;;  %1684 = vmatprep.mubr.f32.mxu0 %v2514_v0  ;;  %v1523_v0 = vld [vmem:[#allocation7 + $0x130] sm:$0xff] }
 0x7fc   :  { %2360 = vmatprep.subr.bf16.mxu0 %v2359_v49  ;;  %v2373_v7 = vpack.c.bf16 %v1523_v0, %v1519_v4 }
 0x7ff   :  { %2362 = vmatpush1.bf16.msra.mxu0 %v2361_v53 }
 0x800   :  { %2364 = vmatprep.subr.bf16.mxu0 %v2363_v54 }
 0x803   :  { %2366 = vmatpush1.bf16.msra.mxu0 %v2365_v59 }
 0x804   :  { %2368 = vmatprep.subr.bf16.mxu0 %v2367_v60 }
 0x807   :  { %2370 = vmatpush1.bf16.msra.mxu0 %v2369_v2 }
 0x808   :  { %2372 = vmatprep.subr.bf16.mxu0 %v2371_v3 }
 0x80b   :  { %2374 = vmatpush1.bf16.msra.mxu0 %v2373_v7 }
 0x80c   :  { %2376 = vmatprep.subr.bf16.mxu0 %v2375_v8 }
 0x80f   :  { %2378 = vmatpush1.bf16.msra.mxu0 %v2377_v13 }
 0x810   :  { %2380 = vmatprep.subr.bf16.mxu0 %v2379_v14 }
 0x813   :  { %2382 = vmatpush1.bf16.msra.mxu0 %v2381_v19 }
 0x814   :  { %2384 = vmatprep.subr.bf16.mxu0 %v2383_v20 }
 0x817   :  { %2386 = vmatpush1.bf16.msra.mxu0 %v2385_v23 }
 0x81a   :  { %1685 = vmatmul.mubr.f32.vlgmr.msra.gmra.mrb[38].mxu0 %v1484_v48 }
 0x8cd   :  { %v1615_v24 = vpop.f32.mrb[36].mxu0 }
 0x8ce   :  { %v1617_v25 = vpop.f32.mrb[37].mxu0 }
 0x8cf   :  { %v2388_v26 = vpack.c.bf16 %v1617_v25, %v1615_v24 }
 0x8d1   :  { %2389 = vmatpush3.bf16.msra.mxu1 %v2388_v26 }
 0x8d2   :  { %2390 = vmatprep.subr.bf16.mxu1 %v2515_v37 }
 0x8ed   :  { %v1686_v30 = vpop.f32.mrb[38].mxu0 }
 0x8ee   :  { %v1688_v32 = vpop.f32.mrb[39].mxu0 }
 0x8ef   :  { %v2391_v33 = vpack.c.bf16 %v1688_v32, %v1686_v30 }
 0x8f1   :  { %2392 = vmatpush3.bf16.msra.mxu1 %v2391_v33 }
 0x8f4   :  { %1925 = vmatmul.mubr.msk.f32.vlgmr.msra.gmra.mrb[36].mxu1 %vm1692_vm2, %v1691_v34 }
 0x9c7   :  { %v1762_v35 = vpop.f32.mrb[36].mxu1 }
 0x9c8   :  { %v1766_v36 = vsub.f32 0.0, %v1762_v35  ;;  %v1926_v38 = vpop.f32.mrb[37].mxu1 }
 0x9ca   :  { %v1767_v39 = vmul.f32 1.442695, %v1766_v36 }
 0x9cc   :  { %2408 = vpow2.f32 %v1767_v39 }
 0x9d6   :  { %v2409_v40 = vpop.eup %2408 }
 0x9d7   :  { %v1769_v41 = vadd.f32 1.0, %v2409_v40 }
 0x9d9   :  { %2410 = vrcp.f32 %v1769_v41 }
 0x9e3   :  { %v2411_v42 = vpop.eup %2410 }
 0x9e4   :  { %1772 = vst [vmem:[%s3197_s15] sm:$0x3] %v2411_v42 }
 0x9e5   :  { %1777 = vsyncpa [#allocation3], 1 }
 0x9e6   :  { %1778 = vsyncpa [#allocation5], 1 }
 0x9e7   :  { %1779 = vsyncpa [#allocation8], 1 }

</bundles_post_ra>
